<compile_context>
chip_gen: v6e
topology: v6e:2x2x1
jax: 0.10.0
libtpu: 0.0.40
codegen_flags: <defaults>
</compile_context>

<pallas_src>
import jax
import jax.numpy as jnp
from jax import lax
from jax.experimental import pallas as pl
from jax.experimental.pallas import tpu as pltpu

# ---- Model hyperparameters (nn.Module __init__ args, small demo sizes) ----
VOCAB_SIZE = 48
EMBEDDING_DIM = 16
HIDDEN_DIM = 32
LSTM_LAYERS = 2          # kernel below is specialized to 2 layers
NUM_CLASSES = 11         # nn.Linear(hidden_dim, 11)

BATCH = 2
SEQ_LEN = 8


# --------------------------- Fused Pallas kernel ---------------------------
def _make_fused_kernel(B, T):
    H = HIDDEN_DIM
    V = VOCAB_SIZE
    C = NUM_CLASSES
    H4, H8 = 4 * H, 8 * H

    # Row offsets inside the packed (ROWS, 8H) parameter buffer.
    R_WBIG = 0               # rows [0, 2H):   W_big  (2H, 8H)
    R_E2G = 2 * H            # rows [2H, 2H+V): E2G2  (V, 8H)  = [embed@Wih0+b0 | b1]
    R_FCW = R_E2G + V        # rows [.., ..+H): fc_w  (H, 8H)  cols 0:C used
    R_FCB = R_FCW + H        # row  [.., ..+1): fc_b  (1, 8H)  cols 0:C used

    def kernel(ids_ref, w_ref, out_ref, xg_ref):
        # ---- Embedding + layer-0 input projection as ONE one-hot matmul ----
        ids = ids_ref[...]                                          # (T*B, 1) int32, row r = t*B + b
        vocab_iota = lax.broadcasted_iota(jnp.int32, (T * B, V), 1)
        one_hot = (vocab_iota == ids).astype(jnp.float32)           # (T*B, V)
        e2g2 = w_ref[R_E2G:R_E2G + V, :]                            # (V, 8H)
        # cols 0:4H -> emb@Wih0 + b0 per token ; cols 4H:8H -> b1 (constant rows)
        xg_ref[...] = jnp.dot(one_hot, e2g2,
                              preferred_element_type=jnp.float32)   # (T*B, 8H)

        w_big = w_ref[R_WBIG:R_WBIG + 2 * H, :]                     # (2H, 8H)

        # ---- Wave 0: layer-0 step 0 only (h0_prev = c0_prev = 0) ----
        g0 = xg_ref[0:B, 0:H4]                                      # (B, 4H)
        sig = jax.nn.sigmoid(g0)
        th = jnp.tanh(g0)
        c0 = sig[:, 0:H] * th[:, 2 * H:3 * H]                       # i * g   (f*c_prev = 0)
        h0 = sig[:, 3 * H:4 * H] * jnp.tanh(c0)                     # o * tanh(c)
        c1 = jnp.zeros((B, H), jnp.float32)
        h1 = jnp.zeros((B, H), jnp.float32)

        # ---- Waves 1..T-1: layer-0 step w  +  layer-1 step w-1 (fused) ----
        for w in range(1, T):                       # static -> fully unrolled
            hcat = jnp.concatenate([h0, h1], axis=1)                # (B, 2H)
            gates = jnp.dot(hcat, w_big,
                            preferred_element_type=jnp.float32) \
                    + xg_ref[w * B:(w + 1) * B, :]                  # (B, 8H)
            sig = jax.nn.sigmoid(gates)                             # one EUP pass
            th = jnp.tanh(gates)                                    # one EUP pass
            # layer 0 (cols 0:4H), PyTorch gate order [i, f, g, o]
            c0_new = sig[:, H:2 * H] * c0 + sig[:, 0:H] * th[:, 2 * H:3 * H]
            h0_new = sig[:, 3 * H:4 * H] * jnp.tanh(c0_new)
            # layer 1 (cols 4H:8H) -- uses pre-update h0 via the matmul above
            c1 = sig[:, 5 * H:6 * H] * c1 + sig[:, 4 * H:5 * H] * th[:, 6 * H:7 * H]
            h1 = sig[:, 7 * H:8 * H] * jnp.tanh(c1)
            c0, h0 = c0_new, h0_new

        # ---- Final wave: layer-1 step T-1 only ----
        hcat = jnp.concatenate([h0, h1], axis=1)                    # (B, 2H)
        w1 = w_ref[R_WBIG:R_WBIG + 2 * H, H4:H8]                    # (2H, 4H) = [Wih1; Whh1]
        b1 = xg_ref[0:B, H4:H8]                                     # rows of E2G2[:,4H:] are all b1
        gates = jnp.dot(hcat, w1, preferred_element_type=jnp.float32) + b1
        sig = jax.nn.sigmoid(gates)
        th = jnp.tanh(gates)
        c1 = sig[:, H:2 * H] * c1 + sig[:, 0:H] * th[:, 2 * H:3 * H]
        h1 = sig[:, 3 * H:4 * H] * jnp.tanh(c1)

        # ---- Classifier on the last timestep of the top layer ----
        fcw = w_ref[R_FCW:R_FCW + H, 0:128]                         # (H, 128), cols C:128 are zero
        fcb = w_ref[R_FCB:R_FCB + 1, 0:128]                         # (1, 128)
        out_full = jnp.dot(h1, fcw, preferred_element_type=jnp.float32) + fcb
        out_ref[...] = out_full[:, 0:C]                             # (B, C)

    return kernel


# ------------------------------ Wrapper -------------------------------------
def syllable_counter_forward(ids, packed):
    """ids: (B, T) int32, packed: (ROWS, 8H) f32 -> logits (B, NUM_CLASSES)."""
    B, T = ids.shape
    # Time-major flattened token ids (row r = t*B + b); tiny int reshuffle.
    ids_flat = ids.T.reshape(T * B, 1).astype(jnp.int32)
    return pl.pallas_call(
        _make_fused_kernel(B, T),
        out_shape=jax.ShapeDtypeStruct((B, NUM_CLASSES), jnp.float32),
        scratch_shapes=[pltpu.VMEM((T * B, 8 * HIDDEN_DIM), jnp.float32)],  # staged xg
    )(ids_flat, packed)


# ------------------------- Parameter construction --------------------------
def init_params(key):
    """PyTorch-style params: uniform(-1/sqrt(H), 1/sqrt(H)) for LSTM/Linear."""
    k = 1.0 / jnp.sqrt(jnp.float32(HIDDEN_DIM))
    keys = jax.random.split(key, 4 + 4 * LSTM_LAYERS)
    embed = jax.random.normal(keys[0], (VOCAB_SIZE, EMBEDDING_DIM), jnp.float32)

    w_ih_t, w_hh_t, biases = [], [], []
    for layer in range(LSTM_LAYERS):
        din = EMBEDDING_DIM if layer == 0 else HIDDEN_DIM
        kk = keys[1 + 4 * layer: 1 + 4 * (layer + 1)]
        w_ih = jax.random.uniform(kk[0], (4 * HIDDEN_DIM, din), jnp.float32, -k, k)
        w_hh = jax.random.uniform(kk[1], (4 * HIDDEN_DIM, HIDDEN_DIM), jnp.float32, -k, k)
        b_ih = jax.random.uniform(kk[2], (4 * HIDDEN_DIM,), jnp.float32, -k, k)
        b_hh = jax.random.uniform(kk[3], (4 * HIDDEN_DIM,), jnp.float32, -k, k)
        w_ih_t.append(w_ih.T)                     # (din, 4H)
        w_hh_t.append(w_hh.T)                     # (H,   4H)
        biases.append((b_ih + b_hh)[None, :])     # (1,   4H)

    fc_w = jax.random.uniform(keys[-3], (NUM_CLASSES, HIDDEN_DIM), jnp.float32, -k, k)
    fc_b = jax.random.uniform(keys[-2], (NUM_CLASSES,), jnp.float32, -k, k)

    return {
        "embed": embed,
        "w_ih_t": w_ih_t,
        "w_hh_t": w_hh_t,
        "b": biases,
        "fc_w_t": fc_w.T,            # (H, 11)
        "fc_b": fc_b[None, :],       # (1, 11)
    }


def pack_params(p):
    """One-time weight algebra + packing into a single lane-dense buffer.

    Layout (rows, 256 = 8H lanes), all f32:
      rows [0, 64)    : W_big = [[W_hh0, W_ih1], [0, W_hh1]]        (2H, 8H)
      rows [64, 112)  : E2G2  = [embed @ W_ih0^T + b0 | b1 tiled]   (V, 8H)
      rows [112, 144) : fc_w^T zero-padded to 8H lanes              (H, 8H)
      row  [144]      : fc_b  zero-padded to 8H lanes               (1, 8H)
      rows [145, 152) : zero padding to a multiple of 8 sublanes
    """
    H, V, C = HIDDEN_DIM, VOCAB_SIZE, NUM_CLASSES
    H4, H8 = 4 * H, 8 * H

    w_big = jnp.zeros((2 * H, H8), jnp.float32)
    w_big = w_big.at[0:H, 0:H4].set(p["w_hh_t"][0])       # layer-0 recurrent
    w_big = w_big.at[0:H, H4:H8].set(p["w_ih_t"][1])      # layer-1 input (from h0_t)
    w_big = w_big.at[H:2 * H, H4:H8].set(p["w_hh_t"][1])  # layer-1 recurrent

    # Fold embedding + layer-0 input projection + bias0 (high precision, one-time).
    e2g = jnp.dot(p["embed"], p["w_ih_t"][0],
                  precision=lax.Precision.HIGHEST) + p["b"][0]      # (V, 4H)
    b1_rows = jnp.broadcast_to(p["b"][1], (V, H4))                  # (V, 4H)
    e2g2 = jnp.concatenate([e2g, b1_rows], axis=1)                  # (V, 8H)

    fcw = jnp.zeros((H, H8), jnp.float32).at[:, 0:C].set(p["fc_w_t"])
    fcb = jnp.zeros((1, H8), jnp.float32).at[:, 0:C].set(p["fc_b"])

    packed = jnp.concatenate([w_big, e2g2, fcw, fcb], axis=0)       # (145, 8H)
    pad = (-packed.shape[0]) % 8
    if pad:
        packed = jnp.concatenate(
            [packed, jnp.zeros((pad, H8), jnp.float32)], axis=0)
    return packed


# --------------------------- Pure-JAX reference -----------------------------
def reference_forward(ids, params):
    emb = jnp.take(params["embed"], ids, axis=0).astype(jnp.float32)  # (B, T, E)
    x = emb
    B = ids.shape[0]
    H = HIDDEN_DIM
    for layer in range(LSTM_LAYERS):
        w_ih_t = params["w_ih_t"][layer]
        w_hh_t = params["w_hh_t"][layer]
        b = params["b"][layer]

        def step(carry, x_t):
            h, c = carry
            gates = x_t @ w_ih_t + h @ w_hh_t + b
            i = jax.nn.sigmoid(gates[:, 0:H])
            f = jax.nn.sigmoid(gates[:, H:2 * H])
            g = jnp.tanh(gates[:, 2 * H:3 * H])
            o = jax.nn.sigmoid(gates[:, 3 * H:4 * H])
            c_new = f * c + i * g
            h_new = o * jnp.tanh(c_new)
            return (h_new, c_new), h_new

        init = (jnp.zeros((B, H), jnp.float32), jnp.zeros((B, H), jnp.float32))
        _, ys = lax.scan(step, init, jnp.transpose(x, (1, 0, 2)))  # (T, B, H)
        x = jnp.transpose(ys, (1, 0, 2))
    return x[:, -1, :] @ params["fc_w_t"] + params["fc_b"]


# --------------------------------- Main -------------------------------------
if __name__ == "__main__":
    key = jax.random.PRNGKey(0)
    pkey, dkey = jax.random.split(key)
    params = init_params(pkey)
    packed = pack_params(params)
    ids = jax.random.randint(dkey, (BATCH, SEQ_LEN), 0, VOCAB_SIZE, dtype=jnp.int32)

    fwd = jax.jit(syllable_counter_forward)
    out = fwd(ids, packed)
    out = jax.block_until_ready(out)

    ref = reference_forward(ids, params)
    assert out.shape == (BATCH, NUM_CLASSES), out.shape
    assert jnp.allclose(out, ref, atol=1e-3, rtol=1e-3), (out, ref)

    print("KERNEL_OK")
</pallas_src>

<mosaic_0001>
module attributes {stable_mosaic.version = 11 : i64} {
  func.func @kernel(%arg0: memref<16x1xi32, #tpu.memory_space<vmem>>, %arg1: memref<152x256xf32, #tpu.memory_space<vmem>>, %arg2: memref<2x11xf32, #tpu.memory_space<vmem>>, %arg3: memref<16x256xf32, #tpu.memory_space<vmem>>) attributes {dimension_semantics = [], scalar_prefetch = 0 : i64, scratch_operands = 1 : i64, tpu.core_type = #tpu.core_type<tc>} {
    %c0 = arith.constant 0 : index
    %c0_0 = arith.constant 0 : index
    %0 = vector.load %arg0[%c0, %c0_0] : memref<16x1xi32, #tpu.memory_space<vmem>>, vector<16x1xi32>
    %1 = tpu.iota {dimensions = array<i32: 1>} : vector<16x48xi32>
    %2 = vector.broadcast %0 : vector<16x1xi32> to vector<16x48xi32>
    %3 = arith.cmpi eq, %1, %2 : vector<16x48xi32>
    %4 = arith.extui %3 : vector<16x48xi1> to vector<16x48xi32>
    %5 = arith.sitofp %4 : vector<16x48xi32> to vector<16x48xf32>
    %c64 = arith.constant 64 : index
    %c0_1 = arith.constant 0 : index
    %6 = vector.load %arg1[%c64, %c0_1] : memref<152x256xf32, #tpu.memory_space<vmem>>, vector<48x256xf32>
    %cst = arith.constant dense<0.000000e+00> : vector<16x256xf32>
    %7 = tpu.matmul %5, %6, %cst {dimension_numbers = #tpu.dot_dimension_numbers<[1], [0], [0], [1], [0, 0, 1, 1], [], []>} : vector<16x48xf32>, vector<48x256xf32>, vector<16x256xf32> -> vector<16x256xf32>
    %c0_2 = arith.constant 0 : index
    %c0_3 = arith.constant 0 : index
    %8 = vector.load %arg3[%c0_2, %c0_3] : memref<16x256xf32, #tpu.memory_space<vmem>>, vector<16x256xf32>
    tpu.vector_store %arg3[%c0_2, %c0_3], %7 {strides = array<i32>} : memref<16x256xf32, #tpu.memory_space<vmem>>, vector<16x256xf32>,
    %c0_4 = arith.constant 0 : index
    %c0_5 = arith.constant 0 : index
    %9 = vector.load %arg1[%c0_4, %c0_5] : memref<152x256xf32, #tpu.memory_space<vmem>>, vector<64x256xf32>
    %c0_6 = arith.constant 0 : index
    %c0_7 = arith.constant 0 : index
    %10 = vector.load %arg3[%c0_6, %c0_7] : memref<16x256xf32, #tpu.memory_space<vmem>>, vector<2x128xf32>
    %11 = arith.negf %10 : vector<2x128xf32>
    %12 = math.exp %11 : vector<2x128xf32>
    %cst_8 = arith.constant 1.000000e+00 : f32
    %13 = vector.broadcast %cst_8 : f32 to vector<2x128xf32>
    %14 = arith.addf %13, %12 : vector<2x128xf32>
    %15 = arith.divf %13, %14 : vector<2x128xf32>
    %16 = math.tanh %10 : vector<2x128xf32>
    %17 = vector.extract_strided_slice %15 {offsets = [0, 0], sizes = [2, 32], strides = [1, 1]} : vector<2x128xf32> to vector<2x32xf32>
    %18 = vector.extract_strided_slice %16 {offsets = [0, 64], sizes = [2, 32], strides = [1, 1]} : vector<2x128xf32> to vector<2x32xf32>
    %19 = arith.mulf %17, %18 : vector<2x32xf32>
    %20 = vector.extract_strided_slice %15 {offsets = [0, 96], sizes = [2, 32], strides = [1, 1]} : vector<2x128xf32> to vector<2x32xf32>
    %21 = math.tanh %19 : vector<2x32xf32>
    %22 = arith.mulf %20, %21 : vector<2x32xf32>
    %cst_9 = arith.constant 0.000000e+00 : f32
    %23 = vector.broadcast %cst_9 : f32 to vector<2x32xf32>
    %cst_10 = arith.constant 0.000000e+00 : f32
    %24 = vector.broadcast %cst_10 : f32 to vector<2x32xf32>
    %25 = tpu.concatenate %22, %24 in 1 : vector<2x32xf32>, vector<2x32xf32> -> vector<2x64xf32>
    %cst_11 = arith.constant dense<0.000000e+00> : vector<2x256xf32>
    %26 = tpu.matmul %25, %9, %cst_11 {dimension_numbers = #tpu.dot_dimension_numbers<[1], [0], [0], [1], [0, 0, 1, 1], [], []>} : vector<2x64xf32>, vector<64x256xf32>, vector<2x256xf32> -> vector<2x256xf32>
    %c2 = arith.constant 2 : index
    %c0_12 = arith.constant 0 : index
    %27 = vector.load %arg3[%c2, %c0_12] : memref<16x256xf32, #tpu.memory_space<vmem>>, vector<2x256xf32>
    %28 = arith.addf %26, %27 : vector<2x256xf32>
    %29 = arith.negf %28 : vector<2x256xf32>
    %30 = math.exp %29 : vector<2x256xf32>
    %cst_13 = arith.constant 1.000000e+00 : f32
    %31 = vector.broadcast %cst_13 : f32 to vector<2x256xf32>
    %32 = arith.addf %31, %30 : vector<2x256xf32>
    %33 = arith.divf %31, %32 : vector<2x256xf32>
    %34 = math.tanh %28 : vector<2x256xf32>
    %35 = vector.extract_strided_slice %33 {offsets = [0, 32], sizes = [2, 32], strides = [1, 1]} : vector<2x256xf32> to vector<2x32xf32>
    %36 = arith.mulf %35, %19 : vector<2x32xf32>
    %37 = vector.extract_strided_slice %33 {offsets = [0, 0], sizes = [2, 32], strides = [1, 1]} : vector<2x256xf32> to vector<2x32xf32>
    %38 = vector.extract_strided_slice %34 {offsets = [0, 64], sizes = [2, 32], strides = [1, 1]} : vector<2x256xf32> to vector<2x32xf32>
    %39 = arith.mulf %37, %38 : vector<2x32xf32>
    %40 = arith.addf %36, %39 : vector<2x32xf32>
    %41 = vector.extract_strided_slice %33 {offsets = [0, 96], sizes = [2, 32], strides = [1, 1]} : vector<2x256xf32> to vector<2x32xf32>
    %42 = math.tanh %40 : vector<2x32xf32>
    %43 = arith.mulf %41, %42 : vector<2x32xf32>
    %44 = vector.extract_strided_slice %33 {offsets = [0, 160], sizes = [2, 32], strides = [1, 1]} : vector<2x256xf32> to vector<2x32xf32>
    %45 = arith.mulf %44, %23 : vector<2x32xf32>
    %46 = vector.extract_strided_slice %33 {offsets = [0, 128], sizes = [2, 32], strides = [1, 1]} : vector<2x256xf32> to vector<2x32xf32>
    %47 = vector.extract_strided_slice %34 {offsets = [0, 192], sizes = [2, 32], strides = [1, 1]} : vector<2x256xf32> to vector<2x32xf32>
    %48 = arith.mulf %46, %47 : vector<2x32xf32>
    %49 = arith.addf %45, %48 : vector<2x32xf32>
    %50 = vector.extract_strided_slice %33 {offsets = [0, 224], sizes = [2, 32], strides = [1, 1]} : vector<2x256xf32> to vector<2x32xf32>
    %51 = math.tanh %49 : vector<2x32xf32>
    %52 = arith.mulf %50, %51 : vector<2x32xf32>
    %53 = tpu.concatenate %43, %52 in 1 : vector<2x32xf32>, vector<2x32xf32> -> vector<2x64xf32>
    %cst_14 = arith.constant dense<0.000000e+00> : vector<2x256xf32>
    %54 = tpu.matmul %53, %9, %cst_14 {dimension_numbers = #tpu.dot_dimension_numbers<[1], [0], [0], [1], [0, 0, 1, 1], [], []>} : vector<2x64xf32>, vector<64x256xf32>, vector<2x256xf32> -> vector<2x256xf32>
    %c4 = arith.constant 4 : index
    %c0_15 = arith.constant 0 : index
    %55 = vector.load %arg3[%c4, %c0_15] : memref<16x256xf32, #tpu.memory_space<vmem>>, vector<2x256xf32>
    %56 = arith.addf %54, %55 : vector<2x256xf32>
    %57 = arith.negf %56 : vector<2x256xf32>
    %58 = math.exp %57 : vector<2x256xf32>
    %cst_16 = arith.constant 1.000000e+00 : f32
    %59 = vector.broadcast %cst_16 : f32 to vector<2x256xf32>
    %60 = arith.addf %59, %58 : vector<2x256xf32>
    %61 = arith.divf %59, %60 : vector<2x256xf32>
    %62 = math.tanh %56 : vector<2x256xf32>
    %63 = vector.extract_strided_slice %61 {offsets = [0, 32], sizes = [2, 32], strides = [1, 1]} : vector<2x256xf32> to vector<2x32xf32>
    %64 = arith.mulf %63, %40 : vector<2x32xf32>
    %65 = vector.extract_strided_slice %61 {offsets = [0, 0], sizes = [2, 32], strides = [1, 1]} : vector<2x256xf32> to vector<2x32xf32>
    %66 = vector.extract_strided_slice %62 {offsets = [0, 64], sizes = [2, 32], strides = [1, 1]} : vector<2x256xf32> to vector<2x32xf32>
    %67 = arith.mulf %65, %66 : vector<2x32xf32>
    %68 = arith.addf %64, %67 : vector<2x32xf32>
    %69 = vector.extract_strided_slice %61 {offsets = [0, 96], sizes = [2, 32], strides = [1, 1]} : vector<2x256xf32> to vector<2x32xf32>
    %70 = math.tanh %68 : vector<2x32xf32>
    %71 = arith.mulf %69, %70 : vector<2x32xf32>
    %72 = vector.extract_strided_slice %61 {offsets = [0, 160], sizes = [2, 32], strides = [1, 1]} : vector<2x256xf32> to vector<2x32xf32>
    %73 = arith.mulf %72, %49 : vector<2x32xf32>
    %74 = vector.extract_strided_slice %61 {offsets = [0, 128], sizes = [2, 32], strides = [1, 1]} : vector<2x256xf32> to vector<2x32xf32>
    %75 = vector.extract_strided_slice %62 {offsets = [0, 192], sizes = [2, 32], strides = [1, 1]} : vector<2x256xf32> to vector<2x32xf32>
    %76 = arith.mulf %74, %75 : vector<2x32xf32>
    %77 = arith.addf %73, %76 : vector<2x32xf32>
    %78 = vector.extract_strided_slice %61 {offsets = [0, 224], sizes = [2, 32], strides = [1, 1]} : vector<2x256xf32> to vector<2x32xf32>
    %79 = math.tanh %77 : vector<2x32xf32>
    %80 = arith.mulf %78, %79 : vector<2x32xf32>
    %81 = tpu.concatenate %71, %80 in 1 : vector<2x32xf32>, vector<2x32xf32> -> vector<2x64xf32>
    %cst_17 = arith.constant dense<0.000000e+00> : vector<2x256xf32>
    %82 = tpu.matmul %81, %9, %cst_17 {dimension_numbers = #tpu.dot_dimension_numbers<[1], [0], [0], [1], [0, 0, 1, 1], [], []>} : vector<2x64xf32>, vector<64x256xf32>, vector<2x256xf32> -> vector<2x256xf32>
    %c6 = arith.constant 6 : index
    %c0_18 = arith.constant 0 : index
    %83 = vector.load %arg3[%c6, %c0_18] : memref<16x256xf32, #tpu.memory_space<vmem>>, vector<2x256xf32>
    %84 = arith.addf %82, %83 : vector<2x256xf32>
    %85 = arith.negf %84 : vector<2x256xf32>
    %86 = math.exp %85 : vector<2x256xf32>
    %cst_19 = arith.constant 1.000000e+00 : f32
    %87 = vector.broadcast %cst_19 : f32 to vector<2x256xf32>
    %88 = arith.addf %87, %86 : vector<2x256xf32>
    %89 = arith.divf %87, %88 : vector<2x256xf32>
    %90 = math.tanh %84 : vector<2x256xf32>
    %91 = vector.extract_strided_slice %89 {offsets = [0, 32], sizes = [2, 32], strides = [1, 1]} : vector<2x256xf32> to vector<2x32xf32>
    %92 = arith.mulf %91, %68 : vector<2x32xf32>
    %93 = vector.extract_strided_slice %89 {offsets = [0, 0], sizes = [2, 32], strides = [1, 1]} : vector<2x256xf32> to vector<2x32xf32>
    %94 = vector.extract_strided_slice %90 {offsets = [0, 64], sizes = [2, 32], strides = [1, 1]} : vector<2x256xf32> to vector<2x32xf32>
    %95 = arith.mulf %93, %94 : vector<2x32xf32>
    %96 = arith.addf %92, %95 : vector<2x32xf32>
    %97 = vector.extract_strided_slice %89 {offsets = [0, 96], sizes = [2, 32], strides = [1, 1]} : vector<2x256xf32> to vector<2x32xf32>
    %98 = math.tanh %96 : vector<2x32xf32>
    %99 = arith.mulf %97, %98 : vector<2x32xf32>
    %100 = vector.extract_strided_slice %89 {offsets = [0, 160], sizes = [2, 32], strides = [1, 1]} : vector<2x256xf32> to vector<2x32xf32>
    %101 = arith.mulf %100, %77 : vector<2x32xf32>
    %102 = vector.extract_strided_slice %89 {offsets = [0, 128], sizes = [2, 32], strides = [1, 1]} : vector<2x256xf32> to vector<2x32xf32>
    %103 = vector.extract_strided_slice %90 {offsets = [0, 192], sizes = [2, 32], strides = [1, 1]} : vector<2x256xf32> to vector<2x32xf32>
    %104 = arith.mulf %102, %103 : vector<2x32xf32>
    %105 = arith.addf %101, %104 : vector<2x32xf32>
    %106 = vector.extract_strided_slice %89 {offsets = [0, 224], sizes = [2, 32], strides = [1, 1]} : vector<2x256xf32> to vector<2x32xf32>
    %107 = math.tanh %105 : vector<2x32xf32>
    %108 = arith.mulf %106, %107 : vector<2x32xf32>
    %109 = tpu.concatenate %99, %108 in 1 : vector<2x32xf32>, vector<2x32xf32> -> vector<2x64xf32>
    %cst_20 = arith.constant dense<0.000000e+00> : vector<2x256xf32>
    %110 = tpu.matmul %109, %9, %cst_20 {dimension_numbers = #tpu.dot_dimension_numbers<[1], [0], [0], [1], [0, 0, 1, 1], [], []>} : vector<2x64xf32>, vector<64x256xf32>, vector<2x256xf32> -> vector<2x256xf32>
    %c8 = arith.constant 8 : index
    %c0_21 = arith.constant 0 : index
    %111 = vector.load %arg3[%c8, %c0_21] : memref<16x256xf32, #tpu.memory_space<vmem>>, vector<2x256xf32>
    %112 = arith.addf %110, %111 : vector<2x256xf32>
    %113 = arith.negf %112 : vector<2x256xf32>
    %114 = math.exp %113 : vector<2x256xf32>
    %cst_22 = arith.constant 1.000000e+00 : f32
    %115 = vector.broadcast %cst_22 : f32 to vector<2x256xf32>
    %116 = arith.addf %115, %114 : vector<2x256xf32>
    %117 = arith.divf %115, %116 : vector<2x256xf32>
    %118 = math.tanh %112 : vector<2x256xf32>
    %119 = vector.extract_strided_slice %117 {offsets = [0, 32], sizes = [2, 32], strides = [1, 1]} : vector<2x256xf32> to vector<2x32xf32>
    %120 = arith.mulf %119, %96 : vector<2x32xf32>
    %121 = vector.extract_strided_slice %117 {offsets = [0, 0], sizes = [2, 32], strides = [1, 1]} : vector<2x256xf32> to vector<2x32xf32>
    %122 = vector.extract_strided_slice %118 {offsets = [0, 64], sizes = [2, 32], strides = [1, 1]} : vector<2x256xf32> to vector<2x32xf32>
    %123 = arith.mulf %121, %122 : vector<2x32xf32>
    %124 = arith.addf %120, %123 : vector<2x32xf32>
    %125 = vector.extract_strided_slice %117 {offsets = [0, 96], sizes = [2, 32], strides = [1, 1]} : vector<2x256xf32> to vector<2x32xf32>
    %126 = math.tanh %124 : vector<2x32xf32>
    %127 = arith.mulf %125, %126 : vector<2x32xf32>
    %128 = vector.extract_strided_slice %117 {offsets = [0, 160], sizes = [2, 32], strides = [1, 1]} : vector<2x256xf32> to vector<2x32xf32>
    %129 = arith.mulf %128, %105 : vector<2x32xf32>
    %130 = vector.extract_strided_slice %117 {offsets = [0, 128], sizes = [2, 32], strides = [1, 1]} : vector<2x256xf32> to vector<2x32xf32>
    %131 = vector.extract_strided_slice %118 {offsets = [0, 192], sizes = [2, 32], strides = [1, 1]} : vector<2x256xf32> to vector<2x32xf32>
    %132 = arith.mulf %130, %131 : vector<2x32xf32>
    %133 = arith.addf %129, %132 : vector<2x32xf32>
    %134 = vector.extract_strided_slice %117 {offsets = [0, 224], sizes = [2, 32], strides = [1, 1]} : vector<2x256xf32> to vector<2x32xf32>
    %135 = math.tanh %133 : vector<2x32xf32>
    %136 = arith.mulf %134, %135 : vector<2x32xf32>
    %137 = tpu.concatenate %127, %136 in 1 : vector<2x32xf32>, vector<2x32xf32> -> vector<2x64xf32>
    %cst_23 = arith.constant dense<0.000000e+00> : vector<2x256xf32>
    %138 = tpu.matmul %137, %9, %cst_23 {dimension_numbers = #tpu.dot_dimension_numbers<[1], [0], [0], [1], [0, 0, 1, 1], [], []>} : vector<2x64xf32>, vector<64x256xf32>, vector<2x256xf32> -> vector<2x256xf32>
    %c10 = arith.constant 10 : index
    %c0_24 = arith.constant 0 : index
    %139 = vector.load %arg3[%c10, %c0_24] : memref<16x256xf32, #tpu.memory_space<vmem>>, vector<2x256xf32>
    %140 = arith.addf %138, %139 : vector<2x256xf32>
    %141 = arith.negf %140 : vector<2x256xf32>
    %142 = math.exp %141 : vector<2x256xf32>
    %cst_25 = arith.constant 1.000000e+00 : f32
    %143 = vector.broadcast %cst_25 : f32 to vector<2x256xf32>
    %144 = arith.addf %143, %142 : vector<2x256xf32>
    %145 = arith.divf %143, %144 : vector<2x256xf32>
    %146 = math.tanh %140 : vector<2x256xf32>
    %147 = vector.extract_strided_slice %145 {offsets = [0, 32], sizes = [2, 32], strides = [1, 1]} : vector<2x256xf32> to vector<2x32xf32>
    %148 = arith.mulf %147, %124 : vector<2x32xf32>
    %149 = vector.extract_strided_slice %145 {offsets = [0, 0], sizes = [2, 32], strides = [1, 1]} : vector<2x256xf32> to vector<2x32xf32>
    %150 = vector.extract_strided_slice %146 {offsets = [0, 64], sizes = [2, 32], strides = [1, 1]} : vector<2x256xf32> to vector<2x32xf32>
    %151 = arith.mulf %149, %150 : vector<2x32xf32>
    %152 = arith.addf %148, %151 : vector<2x32xf32>
    %153 = vector.extract_strided_slice %145 {offsets = [0, 96], sizes = [2, 32], strides = [1, 1]} : vector<2x256xf32> to vector<2x32xf32>
    %154 = math.tanh %152 : vector<2x32xf32>
    %155 = arith.mulf %153, %154 : vector<2x32xf32>
    %156 = vector.extract_strided_slice %145 {offsets = [0, 160], sizes = [2, 32], strides = [1, 1]} : vector<2x256xf32> to vector<2x32xf32>
    %157 = arith.mulf %156, %133 : vector<2x32xf32>
    %158 = vector.extract_strided_slice %145 {offsets = [0, 128], sizes = [2, 32], strides = [1, 1]} : vector<2x256xf32> to vector<2x32xf32>
    %159 = vector.extract_strided_slice %146 {offsets = [0, 192], sizes = [2, 32], strides = [1, 1]} : vector<2x256xf32> to vector<2x32xf32>
    %160 = arith.mulf %158, %159 : vector<2x32xf32>
    %161 = arith.addf %157, %160 : vector<2x32xf32>
    %162 = vector.extract_strided_slice %145 {offsets = [0, 224], sizes = [2, 32], strides = [1, 1]} : vector<2x256xf32> to vector<2x32xf32>
    %163 = math.tanh %161 : vector<2x32xf32>
    %164 = arith.mulf %162, %163 : vector<2x32xf32>
    %165 = tpu.concatenate %155, %164 in 1 : vector<2x32xf32>, vector<2x32xf32> -> vector<2x64xf32>
    %cst_26 = arith.constant dense<0.000000e+00> : vector<2x256xf32>
    %166 = tpu.matmul %165, %9, %cst_26 {dimension_numbers = #tpu.dot_dimension_numbers<[1], [0], [0], [1], [0, 0, 1, 1], [], []>} : vector<2x64xf32>, vector<64x256xf32>, vector<2x256xf32> -> vector<2x256xf32>
    %c12 = arith.constant 12 : index
    %c0_27 = arith.constant 0 : index
    %167 = vector.load %arg3[%c12, %c0_27] : memref<16x256xf32, #tpu.memory_space<vmem>>, vector<2x256xf32>
    %168 = arith.addf %166, %167 : vector<2x256xf32>
    %169 = arith.negf %168 : vector<2x256xf32>
    %170 = math.exp %169 : vector<2x256xf32>
    %cst_28 = arith.constant 1.000000e+00 : f32
    %171 = vector.broadcast %cst_28 : f32 to vector<2x256xf32>
    %172 = arith.addf %171, %170 : vector<2x256xf32>
    %173 = arith.divf %171, %172 : vector<2x256xf32>
    %174 = math.tanh %168 : vector<2x256xf32>
    %175 = vector.extract_strided_slice %173 {offsets = [0, 32], sizes = [2, 32], strides = [1, 1]} : vector<2x256xf32> to vector<2x32xf32>
    %176 = arith.mulf %175, %152 : vector<2x32xf32>
    %177 = vector.extract_strided_slice %173 {offsets = [0, 0], sizes = [2, 32], strides = [1, 1]} : vector<2x256xf32> to vector<2x32xf32>
    %178 = vector.extract_strided_slice %174 {offsets = [0, 64], sizes = [2, 32], strides = [1, 1]} : vector<2x256xf32> to vector<2x32xf32>
    %179 = arith.mulf %177, %178 : vector<2x32xf32>
    %180 = arith.addf %176, %179 : vector<2x32xf32>
    %181 = vector.extract_strided_slice %173 {offsets = [0, 96], sizes = [2, 32], strides = [1, 1]} : vector<2x256xf32> to vector<2x32xf32>
    %182 = math.tanh %180 : vector<2x32xf32>
    %183 = arith.mulf %181, %182 : vector<2x32xf32>
    %184 = vector.extract_strided_slice %173 {offsets = [0, 160], sizes = [2, 32], strides = [1, 1]} : vector<2x256xf32> to vector<2x32xf32>
    %185 = arith.mulf %184, %161 : vector<2x32xf32>
    %186 = vector.extract_strided_slice %173 {offsets = [0, 128], sizes = [2, 32], strides = [1, 1]} : vector<2x256xf32> to vector<2x32xf32>
    %187 = vector.extract_strided_slice %174 {offsets = [0, 192], sizes = [2, 32], strides = [1, 1]} : vector<2x256xf32> to vector<2x32xf32>
    %188 = arith.mulf %186, %187 : vector<2x32xf32>
    %189 = arith.addf %185, %188 : vector<2x32xf32>
    %190 = vector.extract_strided_slice %173 {offsets = [0, 224], sizes = [2, 32], strides = [1, 1]} : vector<2x256xf32> to vector<2x32xf32>
    %191 = math.tanh %189 : vector<2x32xf32>
    %192 = arith.mulf %190, %191 : vector<2x32xf32>
    %193 = tpu.concatenate %183, %192 in 1 : vector<2x32xf32>, vector<2x32xf32> -> vector<2x64xf32>
    %cst_29 = arith.constant dense<0.000000e+00> : vector<2x256xf32>
    %194 = tpu.matmul %193, %9, %cst_29 {dimension_numbers = #tpu.dot_dimension_numbers<[1], [0], [0], [1], [0, 0, 1, 1], [], []>} : vector<2x64xf32>, vector<64x256xf32>, vector<2x256xf32> -> vector<2x256xf32>
    %c14 = arith.constant 14 : index
    %c0_30 = arith.constant 0 : index
    %195 = vector.load %arg3[%c14, %c0_30] : memref<16x256xf32, #tpu.memory_space<vmem>>, vector<2x256xf32>
    %196 = arith.addf %194, %195 : vector<2x256xf32>
    %197 = arith.negf %196 : vector<2x256xf32>
    %198 = math.exp %197 : vector<2x256xf32>
    %cst_31 = arith.constant 1.000000e+00 : f32
    %199 = vector.broadcast %cst_31 : f32 to vector<2x256xf32>
    %200 = arith.addf %199, %198 : vector<2x256xf32>
    %201 = arith.divf %199, %200 : vector<2x256xf32>
    %202 = math.tanh %196 : vector<2x256xf32>
    %203 = vector.extract_strided_slice %201 {offsets = [0, 32], sizes = [2, 32], strides = [1, 1]} : vector<2x256xf32> to vector<2x32xf32>
    %204 = arith.mulf %203, %180 : vector<2x32xf32>
    %205 = vector.extract_strided_slice %201 {offsets = [0, 0], sizes = [2, 32], strides = [1, 1]} : vector<2x256xf32> to vector<2x32xf32>
    %206 = vector.extract_strided_slice %202 {offsets = [0, 64], sizes = [2, 32], strides = [1, 1]} : vector<2x256xf32> to vector<2x32xf32>
    %207 = arith.mulf %205, %206 : vector<2x32xf32>
    %208 = arith.addf %204, %207 : vector<2x32xf32>
    %209 = vector.extract_strided_slice %201 {offsets = [0, 96], sizes = [2, 32], strides = [1, 1]} : vector<2x256xf32> to vector<2x32xf32>
    %210 = math.tanh %208 : vector<2x32xf32>
    %211 = arith.mulf %209, %210 : vector<2x32xf32>
    %212 = vector.extract_strided_slice %201 {offsets = [0, 160], sizes = [2, 32], strides = [1, 1]} : vector<2x256xf32> to vector<2x32xf32>
    %213 = arith.mulf %212, %189 : vector<2x32xf32>
    %214 = vector.extract_strided_slice %201 {offsets = [0, 128], sizes = [2, 32], strides = [1, 1]} : vector<2x256xf32> to vector<2x32xf32>
    %215 = vector.extract_strided_slice %202 {offsets = [0, 192], sizes = [2, 32], strides = [1, 1]} : vector<2x256xf32> to vector<2x32xf32>
    %216 = arith.mulf %214, %215 : vector<2x32xf32>
    %217 = arith.addf %213, %216 : vector<2x32xf32>
    %218 = vector.extract_strided_slice %201 {offsets = [0, 224], sizes = [2, 32], strides = [1, 1]} : vector<2x256xf32> to vector<2x32xf32>
    %219 = math.tanh %217 : vector<2x32xf32>
    %220 = arith.mulf %218, %219 : vector<2x32xf32>
    %221 = tpu.concatenate %211, %220 in 1 : vector<2x32xf32>, vector<2x32xf32> -> vector<2x64xf32>
    %c0_32 = arith.constant 0 : index
    %c128 = arith.constant 128 : index
    %222 = vector.load %arg1[%c0_32, %c128] : memref<152x256xf32, #tpu.memory_space<vmem>>, vector<64x128xf32>
    %c0_33 = arith.constant 0 : index
    %c128_34 = arith.constant 128 : index
    %223 = vector.load %arg3[%c0_33, %c128_34] : memref<16x256xf32, #tpu.memory_space<vmem>>, vector<2x128xf32>
    %cst_35 = arith.constant dense<0.000000e+00> : vector<2x128xf32>
    %224 = tpu.matmul %221, %222, %cst_35 {dimension_numbers = #tpu.dot_dimension_numbers<[1], [0], [0], [1], [0, 0, 1, 1], [], []>} : vector<2x64xf32>, vector<64x128xf32>, vector<2x128xf32> -> vector<2x128xf32>
    %225 = arith.addf %224, %223 : vector<2x128xf32>
    %226 = arith.negf %225 : vector<2x128xf32>
    %227 = math.exp %226 : vector<2x128xf32>
    %cst_36 = arith.constant 1.000000e+00 : f32
    %228 = vector.broadcast %cst_36 : f32 to vector<2x128xf32>
    %229 = arith.addf %228, %227 : vector<2x128xf32>
    %230 = arith.divf %228, %229 : vector<2x128xf32>
    %231 = math.tanh %225 : vector<2x128xf32>
    %232 = vector.extract_strided_slice %230 {offsets = [0, 32], sizes = [2, 32], strides = [1, 1]} : vector<2x128xf32> to vector<2x32xf32>
    %233 = arith.mulf %232, %217 : vector<2x32xf32>
    %234 = vector.extract_strided_slice %230 {offsets = [0, 0], sizes = [2, 32], strides = [1, 1]} : vector<2x128xf32> to vector<2x32xf32>
    %235 = vector.extract_strided_slice %231 {offsets = [0, 64], sizes = [2, 32], strides = [1, 1]} : vector<2x128xf32> to vector<2x32xf32>
    %236 = arith.mulf %234, %235 : vector<2x32xf32>
    %237 = arith.addf %233, %236 : vector<2x32xf32>
    %238 = vector.extract_strided_slice %230 {offsets = [0, 96], sizes = [2, 32], strides = [1, 1]} : vector<2x128xf32> to vector<2x32xf32>
    %239 = math.tanh %237 : vector<2x32xf32>
    %240 = arith.mulf %238, %239 : vector<2x32xf32>
    %c112 = arith.constant 112 : index
    %c0_37 = arith.constant 0 : index
    %241 = vector.load %arg1[%c112, %c0_37] : memref<152x256xf32, #tpu.memory_space<vmem>>, vector<32x128xf32>
    %c144 = arith.constant 144 : index
    %c0_38 = arith.constant 0 : index
    %242 = vector.load %arg1[%c144, %c0_38] : memref<152x256xf32, #tpu.memory_space<vmem>>, vector<1x128xf32>
    %cst_39 = arith.constant dense<0.000000e+00> : vector<2x128xf32>
    %243 = tpu.matmul %240, %241, %cst_39 {dimension_numbers = #tpu.dot_dimension_numbers<[1], [0], [0], [1], [0, 0, 1, 1], [], []>} : vector<2x32xf32>, vector<32x128xf32>, vector<2x128xf32> -> vector<2x128xf32>
    %244 = vector.broadcast %242 : vector<1x128xf32> to vector<2x128xf32>
    %245 = arith.addf %243, %244 : vector<2x128xf32>
    %246 = vector.extract_strided_slice %245 {offsets = [0, 0], sizes = [2, 11], strides = [1, 1]} : vector<2x128xf32> to vector<2x11xf32>
    %c0_40 = arith.constant 0 : index
    %c0_41 = arith.constant 0 : index
    %247 = vector.load %arg2[%c0_40, %c0_41] : memref<2x11xf32, #tpu.memory_space<vmem>>, vector<2x11xf32>
    tpu.vector_store %arg2[%c0_40, %c0_41], %246 {strides = array<i32>} : memref<2x11xf32, #tpu.memory_space<vmem>>, vector<2x11xf32>,
    return
  }
}

</mosaic_0001>

<bundles_post_ra>
// kernel: syllable_counter_forward.1
= control target key start
LH: loop header
LB: loop body
LE: loop exit
PB: predicated region body
PF: predicated region fallthrough
CT: control target
= control target key end

     0   :  { %7 = vsyncpa [#allocation4], 0  ;;  %s1951_s0 = inlined_call_operand.vmem [shape: s32[16,1], index: 0, kind: input, shape index: {}]   ;;  %s1952_s1 = inlined_call_operand.hbm [shape: f32[152,256], index: 1, kind: input, shape index: {}]   ;;  %s1953_s2 = inlined_call_operand.hbm [shape: f32[2,11], index: 2, kind: output, shape index: {}]  }
   0x1   :  { %8 = vsyncpa [#allocation5], 0  ;;  %s1607_s9 = smov [#allocation3]  }
   0x2   :  { %s16_s10 = sshll.u32 %s1607_s9, 4  ;;  %s17_s10 = int_to_ptr.vmem [resolvable:$true] %s16_s10 }
   0x3   :  { %s1571_s11 = scalar_lea.vmem %s17_s10, 4864  ;;  %p1576_p1 = scmp.lt.s32.totalorder %s17_s10, %s17_s10 }
   0x4   :  { %p1572_p0 = scmp.ne.s32.totalorder %s17_s10, %s1571_s11  ;;  %p1577_p2 = scmp.lt.s32.totalorder %s1571_s11, %s1571_s11 }
   0x6   :  { %p1578_p3 = por %p1577_p2, %p1576_p1 }
   0x8   :  { %p1579_p4 = pnand %p1578_p3, %p1572_p0 }
   0xa   :  { %1582 = shalt.err (!%p1579_p4)
}
   0xb   :  { %s1608_s12 = smov 256   ;;  %s1609_s13 = smov 16  }
   0xc   :  { %22 = dma.hbm_to_vmem [thread:$0]  %s1952_s1, 4864, %s17_s10, [#allocation4], %s1608_s12, %s1608_s12, %s1609_s13  }
   0xd   :  { %1603 = dma.done.wait [#allocation4], 4864  }
   0xe   :  { %1604 = vsyncadd [#allocation4], 4294962432  ;;  %v1610_v0 = vmov 0   ;;  %v1611_v1 = vmov 0.0   ;;  %v26_v2 = vld [vmem:[%s1951_s0] sm:$0xff]  ;;  %v53_v3 = vld [vmem:[#allocation3 + $0xd8] sm:$0xff]  ;;  %v28_v15 = vlaneseq }
   0xf   :  { %1433 = vset.pattern.permute.xlu0 %v1610_v0  ;;  %125 = vmatprep.mubr.f32.mxu0 %v1611_v1  ;;  %v52_v4 = vld [vmem:[#allocation3 + $0xd0] sm:$0xff]  ;;  %v51_v5 = vld [vmem:[#allocation3 + $0xc8] sm:$0xff]  ;;  %v50_v6 = vld [vmem:[#allocation3 + $0xc0] sm:$0xff]  ;;  %vm54_vm0 = vcmask 392192   ;;  %s1612_s1 = smov 64   ;;  %s1613_s18 = smov 96  }
  0x10   :  { %259 = vmatprep.mubr.f32.mxu1 %v1611_v1  ;;  %1434 = vset.pattern.permute.xlu1 %v1610_v0  ;;  %v49_v7 = vld [vmem:[#allocation3 + $0xb8] sm:$0xff]  ;;  %v48_v8 = vld [vmem:[#allocation3 + $0xb0] sm:$0xff]  ;;  %v47_v9 = vld [vmem:[#allocation3 + $0xa8] sm:$0xff]  ;;  %v1640_v16 = vand.u32 127, %v28_v15  ;;  %s1614_s19 = smov 32   ;;  %vm181_vm2 = vcmask 261120  }
  0x11   :  { %31 = vperm.xlu0 %1433, %v26_v2   ;;  %81 = vmatprep.subr.mxu0 %v53_v3  ;;  %v46_v10 = vld [vmem:[#allocation3 + $0xa0] sm:$0xff]  ;;  %v45_v11 = vld [vmem:[#allocation3 + $0x98] sm:$0xff]  ;;  %v44_v12 = vld [vmem:[#allocation3 + $0x90] sm:$0xff]  ;;  %vm191_vm3 = vcmask 523264   ;;  %vm1615_vm5 = vmmov 0   ;;  %vm1333_vm6 = vcmask 82944  }
  0x12   :  { %82 = vmatpush1.msra.mxu0 %v52_v4  ;;  %v43_v13 = vld [vmem:[#allocation3 + $0x88] sm:$0xff]  ;;  %v42_v14 = vld [vmem:[#allocation3 + $0x80] sm:$0xff]  ;;  %v1650_v29 = vld [vmem:[#allocation3 + $0x78] sm:$0xff] }
  0x13   :  { %83 = vmatprep.subr.mxu0 %v51_v5  ;;  %v1652_v30 = vld [vmem:[#allocation3 + $0x70] sm:$0xff]  ;;  %v1654_v31 = vld [vmem:[#allocation3 + $0x68] sm:$0xff]  ;;  %211 = vmatprep.subr.mxu1 %v1650_v29  ;;  %v1657_v32 = vld [vmem:[#allocation3 + $0x60] sm:$0xff] }
  0x14   :  { %84 = vmatpush1.msra.mxu0 %v50_v6  ;;  %212 = vmatpush1.msra.mxu1 %v1652_v30  ;;  %v1661_v33 = vld [vmem:[#allocation3 + $0x58] sm:$0xff]  ;;  %v1665_v34 = vld [vmem:[#allocation3 + $0x50] sm:$0xff]  ;;  %v1669_v35 = vld [vmem:[#allocation3 + $0x48] sm:$0xff] }
  0x15   :  { %85 = vmatprep.subr.mxu0 %v49_v7  ;;  %213 = vmatprep.subr.mxu1 %v1654_v31  ;;  %v1673_v36 = vld [vmem:[#allocation3 + $0x40] sm:$0xff]  ;;  %v1677_v37 = vld [vmem:[#allocation3 + $0x38] sm:$0xff]  ;;  %v1681_v38 = vld [vmem:[#allocation3 + $0x30] sm:$0xff] }
  0x16   :  { %86 = vmatpush1.msra.mxu0 %v48_v8  ;;  %214 = vmatpush1.msra.mxu1 %v1657_v32  ;;  %v1685_v39 = vld [vmem:[#allocation3 + $0x28] sm:$0xff]  ;;  %v1689_v40 = vld [vmem:[#allocation3 + $0x20] sm:$0xff]  ;;  %v1693_v42 = vld [vmem:[#allocation3 + $0x18] sm:$0xff] }
  0x17   :  { %87 = vmatprep.subr.mxu0 %v47_v9  ;;  %215 = vmatprep.subr.mxu1 %v1661_v33  ;;  %v1697_v43 = vld [vmem:[#allocation3 + $0x10] sm:$0xff]  ;;  %v1700_v44 = vld [vmem:[#allocation3 + $0x8] sm:$0xff]  ;;  %v1710_v45 = vld [vmem:[#allocation3] sm:$0xff] }
  0x18   :  { %88 = vmatpush1.msra.mxu0 %v46_v10  ;;  %216 = vmatpush1.msra.mxu1 %v1665_v34 }
  0x19   :  { %89 = vmatprep.subr.mxu0 %v45_v11  ;;  %217 = vmatprep.subr.mxu1 %v1669_v35 }
  0x1a   :  { %90 = vmatpush1.msra.mxu0 %v44_v12  ;;  %218 = vmatpush1.msra.mxu1 %v1673_v36 }
  0x1b   :  { %91 = vmatprep.subr.mxu0 %v43_v13  ;;  %219 = vmatprep.subr.mxu1 %v1677_v37 }
  0x1c   :  { %92 = vmatpush1.msra.mxu0 %v42_v14  ;;  %220 = vmatpush1.msra.mxu1 %v1681_v38 }
  0x1d   :  { %354 = vmatprep.subr.mxu0 %v1650_v29  ;;  %221 = vmatprep.subr.mxu1 %v1685_v39 }
  0x1e   :  { %222 = vmatpush1.msra.mxu1 %v1689_v40 }
  0x1f   :  { %223 = vmatprep.subr.mxu1 %v1693_v42 }
  0x20   :  { %224 = vmatpush1.msra.mxu1 %v1697_v43 }
  0x21   :  { %225 = vmatprep.subr.mxu1 %v1700_v44 }
  0x22   :  { %226 = vmatpush1.msra.mxu1 %v1710_v45 }
  0x23   :  { %493 = vmatprep.subr.mxu1 %v1650_v29 }
  0x8c   :  { %v32_v17 = vpop.permute.xlu0 %31 }
  0x8d   :  { %vm36_vm1 = vcmp.eq.s32.totalorder %v1640_v16, %v32_v17 }
  0x8e   :  { %v1350_v18 = vsel %vm36_vm1, 1.0, %v1611_v1 }
  0x8f   :  { %1352 = vmatmul.mubr.msk.f32.vlgmr.msra.gmra.mxu0 %vm54_vm0, %v1350_v18  ;;  %v27_v18 = vld [vmem:[%s1951_s0 + $0x8] sm:$0xff]  ;;  %s1616_s0 = smov [#allocation6]  }
  0x90   :  { %131 = vmatprep.mubr.f32.mxu0 %v1611_v1  ;;  %355 = vmatpush1.msra.mxu0 %v1652_v30  ;;  %s1341_s22 = sshll.u32 %s1616_s0, 4  ;;  %s1342_s22 = int_to_ptr.vmem [resolvable:$true] %s1341_s22 }
  0x91   :  { %356 = vmatprep.subr.mxu0 %v1654_v31  ;;  %s1583_s23 = scalar_lea.vmem %s1342_s22, 32  ;;  %p1588_p6 = scmp.lt.s32.totalorder %s1342_s22, %s1342_s22 }
  0x92   :  { %357 = vmatpush1.msra.mxu0 %v1657_v32  ;;  %p1584_p5 = scmp.ne.s32.totalorder %s1342_s22, %s1583_s23  ;;  %p1589_p7 = scmp.lt.s32.totalorder %s1583_s23, %s1583_s23 }
  0x93   :  { %358 = vmatprep.subr.mxu0 %v1661_v33 }
  0x94   :  { %359 = vmatpush1.msra.mxu0 %v1665_v34  ;;  %p1590_p8 = por %p1589_p7, %p1588_p6 }
  0x95   :  { %360 = vmatprep.subr.mxu0 %v1669_v35 }
  0x96   :  { %361 = vmatpush1.msra.mxu0 %v1673_v36  ;;  %p1591_p9 = pnand %p1590_p8, %p1584_p5 }
  0x97   :  { %362 = vmatprep.subr.mxu0 %v1677_v37 }
  0x98   :  { %363 = vmatpush1.msra.mxu0 %v1681_v38 }
  0x99   :  { %364 = vmatprep.subr.mxu0 %v1685_v39 }
  0x9a   :  { %365 = vmatpush1.msra.mxu0 %v1689_v40 }
  0x9b   :  { %366 = vmatprep.subr.mxu0 %v1693_v42 }
  0x9c   :  { %367 = vmatpush1.msra.mxu0 %v1697_v43 }
  0x9d   :  { %368 = vmatprep.subr.mxu0 %v1700_v44 }
  0x9e   :  { %369 = vmatpush1.msra.mxu0 %v1710_v45 }
  0x9f   :  { %626 = vmatprep.subr.mxu0 %v1650_v29 }
 0x14f   :  { %v127_v19 = vpop.f32.mrf.mxu0 }
 0x150   :  { %138 = vst [vmem:[#allocation2 + $0x10] sm:$0xff] %v127_v19 }
 0x151   :  { %v129_v20 = vpop.f32.mrf.mxu0 }
 0x152   :  { %139 = vst [vmem:[#allocation2] sm:$0xff] %v129_v20 }
 0x157   :  { %v158_v21 = vld [vmem:[#allocation2 + $0x10] sm:$0x3]  ;;  %v183_v50 = vld [vmem:[#allocation2 + $0x10] sm:$0xc] }
 0x158   :  { %1435 = vtanh.f32 %v158_v21  ;;  %v1354_v23 = vmul.f32 -1.442695, %v158_v21  ;;  %v187_v52 = vrot.slane %v183_v50, 2 }
 0x159   :  { %v184_v51 = vld [vmem:[#allocation2] sm:$0xc] }
 0x15a   :  { %1437 = vpow2.f32 %v1354_v23  ;;  %v188_v55 = vrot.slane %v184_v51, 2 }
 0x165   :  { %v1436_v22 = vpop.eup %1435 }
 0x166   :  { %167 = vrot.lane.b32.xlu0 %v1436_v22, %s1612_s1 }
 0x167   :  { %v1438_v24 = vpop.eup %1437 }
 0x168   :  { %v162_v25 = vadd.f32 1.0, %v1438_v24 }
 0x16a   :  { %1439 = vrcp.f32 %v162_v25 }
 0x177   :  { %v1440_v26 = vpop.eup %1439 }
 0x1d8   :  { %v168_v27 = vpop.permute.xlu0 %167 }
 0x1d9   :  { %v1647_v28 = vmul.f32 %v1440_v26, %v168_v27 }
 0x1db   :  { %1441 = vtanh.f32 %v1647_v28 }
 0x1e8   :  { %v1442_v41 = vpop.eup %1441 }
 0x1e9   :  { %173 = vrot.lane.b32.xlu1 %v1442_v41, %s1613_s18 }
 0x25b   :  { %v174_v46 = vpop.permute.xlu1 %173 }
 0x25c   :  { %v176_v47 = vmul.f32 %v1440_v26, %v174_v46  ;;  %v327_v46 = vld [vmem:[#allocation2 + $0x10] sm:$0x30] }
 0x25e   :  { %178 = vrot.lane.b32.xlu1 %v176_v47, %s1614_s19  ;;  %v328_v47 = vld [vmem:[#allocation2] sm:$0x30] }
 0x25f   :  { %v332_v51 = vrot.slane %v328_v47, 4 }
 0x2d0   :  { %v179_v48 = vpop.permute.xlu1 %178 }
 0x2d1   :  { %v182_v49 = vsel %vm181_vm2, %v179_v48, 0.0  ;;  %v331_v48 = vrot.slane %v327_v46, 4 }
 0x2d2   :  { %1355 = vmatmul.mubr.msk.f32.vlgmr.msra.gmra.mxu1 %vm191_vm3, %v182_v49 }
 0x2d3   :  { %494 = vmatpush1.msra.mxu1 %v1652_v30  ;;  %541 = vmatprep.mubr.f32.mxu1 %v1611_v1 }
 0x2d4   :  { %495 = vmatprep.subr.mxu1 %v1654_v31 }
 0x2d5   :  { %496 = vmatpush1.msra.mxu1 %v1657_v32 }
 0x2d6   :  { %497 = vmatprep.subr.mxu1 %v1661_v33 }
 0x2d7   :  { %498 = vmatpush1.msra.mxu1 %v1665_v34 }
 0x2d8   :  { %499 = vmatprep.subr.mxu1 %v1669_v35 }
 0x2d9   :  { %500 = vmatpush1.msra.mxu1 %v1673_v36 }
 0x2da   :  { %501 = vmatprep.subr.mxu1 %v1677_v37 }
 0x2db   :  { %502 = vmatpush1.msra.mxu1 %v1681_v38 }
 0x2dc   :  { %503 = vmatprep.subr.mxu1 %v1685_v39 }
 0x2dd   :  { %504 = vmatpush1.msra.mxu1 %v1689_v40 }
 0x2de   :  { %505 = vmatprep.subr.mxu1 %v1693_v42 }
 0x2df   :  { %506 = vmatpush1.msra.mxu1 %v1697_v43 }
 0x2e0   :  { %507 = vmatprep.subr.mxu1 %v1700_v44 }
 0x2e1   :  { %508 = vmatpush1.msra.mxu1 %v1710_v45 }
 0x2e2   :  { %765 = vmatprep.subr.mxu1 %v1650_v29 }
 0x392   :  { %v261_v53 = vpop.f32.mrf.mxu1 }
 0x393   :  { %v262_v54 = vadd.f32 %v261_v53, %v187_v52 }
 0x394   :  { %v263_v56 = vpop.f32.mrf.mxu1 }
 0x395   :  { %1443 = vtanh.f32 %v262_v54  ;;  %v264_v57 = vadd.f32 %v263_v56, %v188_v55  ;;  %v1356_v60 = vmul.f32 -1.442695, %v262_v54 }
 0x397   :  { %1445 = vtanh.f32 %v264_v57  ;;  %v1357_v61 = vmul.f32 -1.442695, %v264_v57 }
 0x398   :  { %1447 = vpow2.f32 %v1356_v60 }
 0x399   :  { %1449 = vpow2.f32 %v1357_v61 }
 0x3a2   :  { %v1444_v58 = vpop.eup %1443 }
 0x3a3   :  { %286 = vrot.lane.b32.xlu0 %v1444_v58, %s1612_s1 }
 0x3a4   :  { %v1446_v59 = vpop.eup %1445 }
 0x3a5   :  { %303 = vrot.lane.b32.xlu1 %v1446_v59, %s1612_s1  ;;  %v1448_v62 = vpop.eup %1447 }
 0x3a6   :  { %v1450_v63 = vpop.eup %1449  ;;  %v272_v0 = vadd.f32 1.0, %v1448_v62 }
 0x3a7   :  { %281 = vrot.lane.b32.xlu0 %v1647_v28, %s1614_s19  ;;  %v273_v2 = vadd.f32 1.0, %v1450_v63 }
 0x3a8   :  { %1451 = vrcp.f32 %v272_v0 }
 0x3a9   :  { %1453 = vrcp.f32 %v273_v2 }
 0x3b5   :  { %v1452_v3 = vpop.eup %1451 }
 0x3b6   :  { %v1454_v6 = vpop.eup %1453 }
 0x3b7   :  { %v301_v13 = vmul.f32 0.0, %v1454_v6 }
 0x415   :  { %v287_v4 = vpop.permute.xlu0 %286 }
 0x416   :  { %v289_v5 = vmul.f32 %v1452_v3, %v287_v4 }
 0x417   :  { %v304_v7 = vpop.permute.xlu1 %303 }
 0x418   :  { %291 = vrot.lane.b32.xlu1 %v289_v5, %s1614_s19  ;;  %v306_v8 = vmul.f32 %v1454_v6, %v304_v7 }
 0x419   :  { %v282_v9 = vpop.permute.xlu0 %281 }
 0x41a   :  { %308 = vrot.lane.b32.xlu0 %v306_v8, %s1614_s19  ;;  %v284_v10 = vmul.f32 %v1452_v3, %v282_v9 }
 0x48a   :  { %v292_v11 = vpop.permute.xlu1 %291 }
 0x48b   :  { %v1742_v12 = vadd.f32 %v292_v11, %v284_v10 }
 0x48c   :  { %v309_v14 = vpop.permute.xlu0 %308 }
 0x48d   :  { %1455 = vtanh.f32 %v1742_v12  ;;  %v1745_v15 = vadd.f32 %v309_v14, %v301_v13 }
 0x48f   :  { %1457 = vtanh.f32 %v1745_v15 }
 0x49a   :  { %v1456_v17 = vpop.eup %1455 }
 0x49b   :  { %297 = vrot.lane.b32.xlu1 %v1456_v17, %s1612_s1 }
 0x49c   :  { %v1458_v19 = vpop.eup %1457 }
 0x49d   :  { %314 = vrot.lane.b32.xlu0 %v1458_v19, %s1612_s1 }
 0x49f   :  { %34 = vperm.xlu1 %1434, %v27_v18  }
 0x50d   :  { %v298_v20 = vpop.permute.xlu1 %297 }
 0x50e   :  { %v300_v21 = vmul.f32 %v1452_v3, %v298_v20 }
 0x50f   :  { %v315_v22 = vpop.permute.xlu0 %314 }
 0x510   :  { %319 = vrot.lane.b32.xlu0 %v300_v21, %s1614_s19  ;;  %v317_v23 = vmul.f32 %v1454_v6, %v315_v22  ;;  %v466_v21 = vld [vmem:[#allocation2 + $0x10] sm:$0xc0]  ;;  %v467_v22 = vld [vmem:[#allocation2] sm:$0xc0] }
 0x512   :  { %323 = vrot.lane.b32.xlu1 %v317_v23, %s1612_s1  ;;  %v470_v23 = vrot.slane %v466_v21, 6 }
 0x51a   :  { %v35_v24 = vpop.permute.xlu1 %34 }
 0x51b   :  { %vm37_vm4 = vcmp.eq.s32.totalorder %v1640_v16, %v35_v24 }
 0x51c   :  { %v1351_v25 = vsel %vm37_vm4, 1.0, %v1611_v1 }
 0x51d   :  { %1353 = vmatmul.mubr.msk.f32.gmra.mxu0 %vm54_vm0, %v1351_v25 }
 0x51e   :  { %402 = vmatprep.mubr.f32.mxu0 %v1611_v1 }
 0x582   :  { %v320_v26 = vpop.permute.xlu0 %319 }
 0x584   :  { %v324_v27 = vpop.permute.xlu1 %323 }
 0x585   :  { %v326_v28 = vsel %vm181_vm2, %v320_v26, %v324_v27  ;;  %v471_v26 = vrot.slane %v467_v22, 6 }
 0x586   :  { %1358 = vmatmul.mubr.msk.f32.vlgmr.msra.gmra.mxu0 %vm191_vm3, %v326_v28 }
 0x587   :  { %627 = vmatpush1.msra.mxu0 %v1652_v30  ;;  %674 = vmatprep.mubr.f32.mxu0 %v1611_v1 }
 0x588   :  { %628 = vmatprep.subr.mxu0 %v1654_v31 }
 0x589   :  { %629 = vmatpush1.msra.mxu0 %v1657_v32 }
 0x58a   :  { %630 = vmatprep.subr.mxu0 %v1661_v33 }
 0x58b   :  { %631 = vmatpush1.msra.mxu0 %v1665_v34 }
 0x58c   :  { %632 = vmatprep.subr.mxu0 %v1669_v35 }
 0x58d   :  { %633 = vmatpush1.msra.mxu0 %v1673_v36 }
 0x58e   :  { %634 = vmatprep.subr.mxu0 %v1677_v37 }
 0x58f   :  { %635 = vmatpush1.msra.mxu0 %v1681_v38 }
 0x590   :  { %636 = vmatprep.subr.mxu0 %v1685_v39 }
 0x591   :  { %637 = vmatpush1.msra.mxu0 %v1689_v40 }
 0x592   :  { %638 = vmatprep.subr.mxu0 %v1693_v42 }
 0x593   :  { %639 = vmatpush1.msra.mxu0 %v1697_v43 }
 0x594   :  { %640 = vmatprep.subr.mxu0 %v1700_v44 }
 0x595   :  { %641 = vmatpush1.msra.mxu0 %v1710_v45 }
 0x596   :  { %904 = vmatprep.subr.mxu0 %v1650_v29 }
 0x5dd   :  { %v133_v16 = vpop.f32.mrf.mxu0 }
 0x5de   :  { %140 = vst [vmem:[#allocation2 + $0x18] sm:$0xff] %v133_v16 }
 0x5df   :  { %v135_v41 = vpop.f32.mrf.mxu0 }
 0x5e0   :  { %141 = vst [vmem:[#allocation2 + $0x8] sm:$0xff] %v135_v41 }
 0x646   :  { %v404_v49 = vpop.f32.mrf.mxu0 }
 0x647   :  { %v405_v50 = vadd.f32 %v404_v49, %v331_v48 }
 0x648   :  { %v406_v52 = vpop.f32.mrf.mxu0 }
 0x649   :  { %1459 = vtanh.f32 %v405_v50  ;;  %v407_v53 = vadd.f32 %v406_v52, %v332_v51  ;;  %v1359_v56 = vmul.f32 -1.442695, %v405_v50 }
 0x64b   :  { %1461 = vtanh.f32 %v407_v53  ;;  %v1360_v57 = vmul.f32 -1.442695, %v407_v53 }
 0x64c   :  { %1463 = vpow2.f32 %v1359_v56 }
 0x64d   :  { %1465 = vpow2.f32 %v1360_v57 }
 0x656   :  { %v1460_v54 = vpop.eup %1459 }
 0x657   :  { %425 = vrot.lane.b32.xlu0 %v1460_v54, %s1612_s1 }
 0x658   :  { %v1462_v55 = vpop.eup %1461 }
 0x659   :  { %442 = vrot.lane.b32.xlu1 %v1462_v55, %s1612_s1  ;;  %v1464_v58 = vpop.eup %1463 }
 0x65a   :  { %v1466_v59 = vpop.eup %1465  ;;  %v415_v60 = vadd.f32 1.0, %v1464_v58 }
 0x65b   :  { %v416_v61 = vadd.f32 1.0, %v1466_v59 }
 0x65c   :  { %1467 = vrcp.f32 %v415_v60 }
 0x65d   :  { %1469 = vrcp.f32 %v416_v61 }
 0x669   :  { %v1468_v62 = vpop.eup %1467 }
 0x66a   :  { %v1470_v2 = vpop.eup %1469  ;;  %v423_v5 = vmul.f32 %v1468_v62, %v1742_v12 }
 0x66b   :  { %v440_v8 = vmul.f32 %v1470_v2, %v1745_v15 }
 0x6c9   :  { %v426_v63 = vpop.permute.xlu0 %425 }
 0x6ca   :  { %v428_v0 = vmul.f32 %v1468_v62, %v426_v63 }
 0x6cb   :  { %v443_v3 = vpop.permute.xlu1 %442 }
 0x6cc   :  { %430 = vrot.lane.b32.xlu0 %v428_v0, %s1614_s19  ;;  %v445_v4 = vmul.f32 %v1470_v2, %v443_v3 }
 0x6ce   :  { %447 = vrot.lane.b32.xlu1 %v445_v4, %s1614_s19 }
 0x73e   :  { %v431_v6 = vpop.permute.xlu0 %430 }
 0x73f   :  { %v1783_v7 = vadd.f32 %v431_v6, %v423_v5 }
 0x740   :  { %v448_v9 = vpop.permute.xlu1 %447 }
 0x741   :  { %1471 = vtanh.f32 %v1783_v7  ;;  %v1787_v10 = vadd.f32 %v448_v9, %v440_v8 }
 0x743   :  { %1473 = vtanh.f32 %v1787_v10 }
 0x74e   :  { %v1472_v11 = vpop.eup %1471 }
 0x74f   :  { %436 = vrot.lane.b32.xlu0 %v1472_v11, %s1612_s1 }
 0x750   :  { %v1474_v13 = vpop.eup %1473 }
 0x751   :  { %453 = vrot.lane.b32.xlu1 %v1474_v13, %s1612_s1 }
 0x7c1   :  { %v437_v14 = vpop.permute.xlu0 %436 }
 0x7c2   :  { %v439_v12 = vmul.f32 %v1468_v62, %v437_v14  ;;  %v606_v14 = vld [vmem:[#allocation2 + $0x8] sm:$0x3] }
 0x7c3   :  { %v454_v17 = vpop.permute.xlu1 %453 }
 0x7c4   :  { %458 = vrot.lane.b32.xlu0 %v439_v12, %s1614_s19  ;;  %v456_v18 = vmul.f32 %v1470_v2, %v454_v17 }
 0x7c6   :  { %462 = vrot.lane.b32.xlu1 %v456_v18, %s1612_s1 }
 0x836   :  { %v459_v15 = vpop.permute.xlu0 %458 }
 0x838   :  { %v463_v19 = vpop.permute.xlu1 %462 }
 0x839   :  { %v465_v20 = vsel %vm181_vm2, %v459_v15, %v463_v19 }
 0x83a   :  { %1361 = vmatmul.mubr.msk.f32.vlgmr.msra.gmra.mxu1 %vm191_vm3, %v465_v20 }
 0x83b   :  { %766 = vmatpush1.msra.mxu1 %v1652_v30  ;;  %813 = vmatprep.mubr.f32.mxu1 %v1611_v1 }
 0x83c   :  { %767 = vmatprep.subr.mxu1 %v1654_v31 }
 0x83d   :  { %768 = vmatpush1.msra.mxu1 %v1657_v32 }
 0x83e   :  { %769 = vmatprep.subr.mxu1 %v1661_v33 }
 0x83f   :  { %770 = vmatpush1.msra.mxu1 %v1665_v34 }
 0x840   :  { %771 = vmatprep.subr.mxu1 %v1669_v35 }
 0x841   :  { %772 = vmatpush1.msra.mxu1 %v1673_v36 }
 0x842   :  { %773 = vmatprep.subr.mxu1 %v1677_v37 }
 0x843   :  { %774 = vmatpush1.msra.mxu1 %v1681_v38 }
 0x844   :  { %775 = vmatprep.subr.mxu1 %v1685_v39 }
 0x845   :  { %776 = vmatpush1.msra.mxu1 %v1689_v40 }
 0x846   :  { %777 = vmatprep.subr.mxu1 %v1693_v42 }
 0x847   :  { %778 = vmatpush1.msra.mxu1 %v1697_v43 }
 0x848   :  { %779 = vmatprep.subr.mxu1 %v1700_v44 }
 0x849   :  { %780 = vmatpush1.msra.mxu1 %v1710_v45 }
 0x84a   :  { %1043 = vmatprep.subr.mxu1 %v1650_v29 }
 0x8fa   :  { %v543_v24 = vpop.f32.mrf.mxu1 }
 0x8fb   :  { %v544_v25 = vadd.f32 %v543_v24, %v470_v23 }
 0x8fc   :  { %v545_v27 = vpop.f32.mrf.mxu1 }
 0x8fd   :  { %1475 = vtanh.f32 %v544_v25  ;;  %v546_v28 = vadd.f32 %v545_v27, %v471_v26  ;;  %v1362_v46 = vmul.f32 -1.442695, %v544_v25 }
 0x8ff   :  { %1477 = vtanh.f32 %v546_v28  ;;  %v1363_v47 = vmul.f32 -1.442695, %v546_v28 }
 0x900   :  { %1479 = vpow2.f32 %v1362_v46 }
 0x901   :  { %1481 = vpow2.f32 %v1363_v47 }
 0x90a   :  { %v1476_v16 = vpop.eup %1475 }
 0x90b   :  { %564 = vrot.lane.b32.xlu0 %v1476_v16, %s1612_s1 }
 0x90c   :  { %v1478_v41 = vpop.eup %1477 }
 0x90d   :  { %581 = vrot.lane.b32.xlu1 %v1478_v41, %s1612_s1  ;;  %v1480_v48 = vpop.eup %1479 }
 0x90e   :  { %v1482_v49 = vpop.eup %1481  ;;  %v554_v50 = vadd.f32 1.0, %v1480_v48 }
 0x90f   :  { %v555_v51 = vadd.f32 1.0, %v1482_v49 }
 0x910   :  { %1483 = vrcp.f32 %v554_v50 }
 0x911   :  { %1485 = vrcp.f32 %v555_v51 }
 0x91d   :  { %v1484_v52 = vpop.eup %1483 }
 0x91e   :  { %v1486_v55 = vpop.eup %1485  ;;  %v562_v58 = vmul.f32 %v1484_v52, %v1783_v7 }
 0x91f   :  { %v579_v61 = vmul.f32 %v1486_v55, %v1787_v10  ;;  %v605_v10 = vld [vmem:[#allocation2 + $0x18] sm:$0x3] }
 0x97d   :  { %v565_v53 = vpop.permute.xlu0 %564 }
 0x97e   :  { %v567_v54 = vmul.f32 %v1484_v52, %v565_v53 }
 0x97f   :  { %v582_v56 = vpop.permute.xlu1 %581 }
 0x980   :  { %569 = vrot.lane.b32.xlu0 %v567_v54, %s1614_s19  ;;  %v584_v57 = vmul.f32 %v1486_v55, %v582_v56 }
 0x982   :  { %586 = vrot.lane.b32.xlu1 %v584_v57, %s1614_s19 }
 0x9f2   :  { %v570_v59 = vpop.permute.xlu0 %569 }
 0x9f3   :  { %v1818_v60 = vadd.f32 %v570_v59, %v562_v58 }
 0x9f4   :  { %v587_v62 = vpop.permute.xlu1 %586 }
 0x9f5   :  { %1487 = vtanh.f32 %v1818_v60  ;;  %v1822_v63 = vadd.f32 %v587_v62, %v579_v61 }
 0x9f7   :  { %1489 = vtanh.f32 %v1822_v63 }
 0xa02   :  { %v1488_v0 = vpop.eup %1487 }
 0xa03   :  { %575 = vrot.lane.b32.xlu0 %v1488_v0, %s1612_s1 }
 0xa04   :  { %v1490_v2 = vpop.eup %1489 }
 0xa05   :  { %592 = vrot.lane.b32.xlu1 %v1490_v2, %s1612_s1 }
 0xa75   :  { %v576_v3 = vpop.permute.xlu0 %575 }
 0xa76   :  { %v578_v4 = vmul.f32 %v1484_v52, %v576_v3 }
 0xa77   :  { %v593_v5 = vpop.permute.xlu1 %592 }
 0xa78   :  { %597 = vrot.lane.b32.xlu0 %v578_v4, %s1614_s19  ;;  %v595_v6 = vmul.f32 %v1486_v55, %v593_v5 }
 0xa7a   :  { %601 = vrot.lane.b32.xlu1 %v595_v6, %s1612_s1 }
 0xaea   :  { %v598_v7 = vpop.permute.xlu0 %597 }
 0xaec   :  { %v602_v8 = vpop.permute.xlu1 %601 }
 0xaed   :  { %v604_v9 = vsel %vm181_vm2, %v598_v7, %v602_v8 }
 0xaee   :  { %1364 = vmatmul.mubr.msk.f32.vlgmr.msra.gmra.mxu0 %vm191_vm3, %v604_v9 }
 0xaef   :  { %905 = vmatpush1.msra.mxu0 %v1652_v30  ;;  %952 = vmatprep.mubr.f32.mxu0 %v1611_v1 }
 0xaf0   :  { %906 = vmatprep.subr.mxu0 %v1654_v31 }
 0xaf1   :  { %907 = vmatpush1.msra.mxu0 %v1657_v32 }
 0xaf2   :  { %908 = vmatprep.subr.mxu0 %v1661_v33 }
 0xaf3   :  { %909 = vmatpush1.msra.mxu0 %v1665_v34 }
 0xaf4   :  { %910 = vmatprep.subr.mxu0 %v1669_v35 }
 0xaf5   :  { %911 = vmatpush1.msra.mxu0 %v1673_v36 }
 0xaf6   :  { %912 = vmatprep.subr.mxu0 %v1677_v37 }
 0xaf7   :  { %913 = vmatpush1.msra.mxu0 %v1681_v38 }
 0xaf8   :  { %914 = vmatprep.subr.mxu0 %v1685_v39 }
 0xaf9   :  { %915 = vmatpush1.msra.mxu0 %v1689_v40 }
 0xafa   :  { %916 = vmatprep.subr.mxu0 %v1693_v42 }
 0xafb   :  { %917 = vmatpush1.msra.mxu0 %v1697_v43 }
 0xafc   :  { %918 = vmatprep.subr.mxu0 %v1700_v44 }
 0xafd   :  { %919 = vmatpush1.msra.mxu0 %v1710_v45 }
 0xafe   :  { %1393 = vmatprep.subr.mxu0 %v1611_v1 }
 0xbae   :  { %v676_v11 = vpop.f32.mrf.mxu0 }
 0xbaf   :  { %v677_v13 = vadd.f32 %v676_v11, %v605_v10 }
 0xbb0   :  { %v678_v12 = vpop.f32.mrf.mxu0 }
 0xbb1   :  { %1491 = vtanh.f32 %v677_v13  ;;  %v679_v17 = vadd.f32 %v678_v12, %v606_v14  ;;  %v1365_v19 = vmul.f32 -1.442695, %v677_v13 }
 0xbb3   :  { %1493 = vtanh.f32 %v679_v17  ;;  %v1366_v20 = vmul.f32 -1.442695, %v679_v17 }
 0xbb4   :  { %1495 = vpow2.f32 %v1365_v19 }
 0xbb5   :  { %1497 = vpow2.f32 %v1366_v20 }
 0xbbe   :  { %v1492_v18 = vpop.eup %1491 }
 0xbbf   :  { %697 = vrot.lane.b32.xlu0 %v1492_v18, %s1612_s1 }
 0xbc0   :  { %v1494_v15 = vpop.eup %1493 }
 0xbc1   :  { %714 = vrot.lane.b32.xlu1 %v1494_v15, %s1612_s1  ;;  %v1496_v21 = vpop.eup %1495 }
 0xbc2   :  { %v1498_v22 = vpop.eup %1497  ;;  %v687_v23 = vadd.f32 1.0, %v1496_v21 }
 0xbc3   :  { %v688_v24 = vadd.f32 1.0, %v1498_v22 }
 0xbc4   :  { %1499 = vrcp.f32 %v687_v23 }
 0xbc5   :  { %1501 = vrcp.f32 %v688_v24 }
 0xbd1   :  { %v1500_v25 = vpop.eup %1499 }
 0xbd2   :  { %v1502_v28 = vpop.eup %1501  ;;  %v695_v46 = vmul.f32 %v1500_v25, %v1818_v60 }
 0xbd3   :  { %v712_v49 = vmul.f32 %v1502_v28, %v1822_v63 }
 0xc31   :  { %v698_v26 = vpop.permute.xlu0 %697 }
 0xc32   :  { %v700_v27 = vmul.f32 %v1500_v25, %v698_v26 }
 0xc33   :  { %v715_v16 = vpop.permute.xlu1 %714 }
 0xc34   :  { %702 = vrot.lane.b32.xlu0 %v700_v27, %s1614_s19  ;;  %v717_v41 = vmul.f32 %v1502_v28, %v715_v16 }
 0xc36   :  { %719 = vrot.lane.b32.xlu1 %v717_v41, %s1614_s19 }
 0xca6   :  { %v703_v47 = vpop.permute.xlu0 %702 }
 0xca7   :  { %v1853_v48 = vadd.f32 %v703_v47, %v695_v46 }
 0xca8   :  { %v720_v50 = vpop.permute.xlu1 %719 }
 0xca9   :  { %1503 = vtanh.f32 %v1853_v48  ;;  %v1857_v51 = vadd.f32 %v720_v50, %v712_v49 }
 0xcab   :  { %1505 = vtanh.f32 %v1857_v51 }
 0xcb6   :  { %v1504_v52 = vpop.eup %1503 }
 0xcb7   :  { %708 = vrot.lane.b32.xlu0 %v1504_v52, %s1612_s1 }
 0xcb8   :  { %v1506_v53 = vpop.eup %1505 }
 0xcb9   :  { %725 = vrot.lane.b32.xlu1 %v1506_v53, %s1612_s1 }
 0xd29   :  { %v709_v54 = vpop.permute.xlu0 %708 }
 0xd2a   :  { %v711_v55 = vmul.f32 %v1500_v25, %v709_v54 }
 0xd2b   :  { %v726_v56 = vpop.permute.xlu1 %725 }
 0xd2c   :  { %730 = vrot.lane.b32.xlu0 %v711_v55, %s1614_s19  ;;  %v728_v57 = vmul.f32 %v1502_v28, %v726_v56 }
 0xd2e   :  { %734 = vrot.lane.b32.xlu1 %v728_v57, %s1612_s1 }
 0xd9e   :  { %v731_v58 = vpop.permute.xlu0 %730 }
 0xda0   :  { %v735_v59 = vpop.permute.xlu1 %734 }
 0xda1   :  { %v737_v60 = vsel %vm181_vm2, %v731_v58, %v735_v59 }
 0xda2   :  { %1367 = vmatmul.mubr.msk.f32.vlgmr.msra.gmra.mxu1 %vm191_vm3, %v737_v60 }
 0xda3   :  { %1044 = vmatpush1.msra.mxu1 %v1652_v30  ;;  %1091 = vmatprep.mubr.f32.mxu1 %v1611_v1  ;;  %v738_v30 = vld [vmem:[#allocation2 + $0x18] sm:$0xc] }
 0xda4   :  { %1045 = vmatprep.subr.mxu1 %v1654_v31 }
 0xda5   :  { %1046 = vmatpush1.msra.mxu1 %v1657_v32  ;;  %v739_v32 = vld [vmem:[#allocation2 + $0x8] sm:$0xc] }
 0xda6   :  { %1047 = vmatprep.subr.mxu1 %v1661_v33 }
 0xda7   :  { %1048 = vmatpush1.msra.mxu1 %v1665_v34  ;;  %v742_v34 = vrot.slane %v738_v30, 2 }
 0xda8   :  { %1049 = vmatprep.subr.mxu1 %v1669_v35 }
 0xda9   :  { %1050 = vmatpush1.msra.mxu1 %v1673_v36 }
 0xdaa   :  { %1051 = vmatprep.subr.mxu1 %v1677_v37 }
 0xdab   :  { %1052 = vmatpush1.msra.mxu1 %v1681_v38  ;;  %v743_v38 = vrot.slane %v739_v32, 2 }
 0xdac   :  { %1053 = vmatprep.subr.mxu1 %v1685_v39 }
 0xdad   :  { %1054 = vmatpush1.msra.mxu1 %v1689_v40 }
 0xdae   :  { %1055 = vmatprep.subr.mxu1 %v1693_v42 }
 0xdaf   :  { %1056 = vmatpush1.msra.mxu1 %v1697_v43 }
 0xdb0   :  { %1057 = vmatprep.subr.mxu1 %v1700_v44 }
 0xdb1   :  { %1058 = vmatpush1.msra.mxu1 %v1710_v45 }
 0xdb2   :  { %1412 = vmatprep.subr.mxu1 %v1611_v1 }
 0xe62   :  { %v815_v36 = vpop.f32.mrf.mxu1 }
 0xe63   :  { %v816_v61 = vadd.f32 %v815_v36, %v742_v34 }
 0xe64   :  { %v817_v62 = vpop.f32.mrf.mxu1 }
 0xe65   :  { %1507 = vtanh.f32 %v816_v61  ;;  %v818_v63 = vadd.f32 %v817_v62, %v743_v38  ;;  %v1368_v0 = vmul.f32 -1.442695, %v816_v61 }
 0xe67   :  { %1509 = vtanh.f32 %v818_v63  ;;  %v1369_v45 = vmul.f32 -1.442695, %v818_v63 }
 0xe68   :  { %1511 = vpow2.f32 %v1368_v0 }
 0xe69   :  { %1513 = vpow2.f32 %v1369_v45  ;;  %v1016_v45 = vld [vmem:[#allocation2 + $0x18] sm:$0xc0] }
 0xe72   :  { %v1508_v40 = vpop.eup %1507 }
 0xe73   :  { %836 = vrot.lane.b32.xlu0 %v1508_v40, %s1612_s1 }
 0xe74   :  { %v1510_v43 = vpop.eup %1509 }
 0xe75   :  { %853 = vrot.lane.b32.xlu1 %v1510_v43, %s1612_s1  ;;  %v1512_v2 = vpop.eup %1511 }
 0xe76   :  { %v1514_v3 = vpop.eup %1513  ;;  %v826_v4 = vadd.f32 1.0, %v1512_v2  ;;  %v1017_v2 = vld [vmem:[#allocation2 + $0x8] sm:$0xc0] }
 0xe77   :  { %v827_v5 = vadd.f32 1.0, %v1514_v3  ;;  %v1020_v3 = vrot.slane %v1016_v45, 6 }
 0xe78   :  { %1515 = vrcp.f32 %v826_v4 }
 0xe79   :  { %1517 = vrcp.f32 %v827_v5 }
 0xe85   :  { %v1516_v6 = vpop.eup %1515 }
 0xe86   :  { %v1518_v9 = vpop.eup %1517  ;;  %v834_v13 = vmul.f32 %v1516_v6, %v1853_v48 }
 0xe87   :  { %v851_v17 = vmul.f32 %v1518_v9, %v1857_v51 }
 0xee5   :  { %v837_v7 = vpop.permute.xlu0 %836 }
 0xee6   :  { %v839_v8 = vmul.f32 %v1516_v6, %v837_v7 }
 0xee7   :  { %v854_v10 = vpop.permute.xlu1 %853 }
 0xee8   :  { %841 = vrot.lane.b32.xlu0 %v839_v8, %s1614_s19  ;;  %v856_v11 = vmul.f32 %v1518_v9, %v854_v10 }
 0xeea   :  { %858 = vrot.lane.b32.xlu1 %v856_v11, %s1614_s19 }
 0xf5a   :  { %v842_v14 = vpop.permute.xlu0 %841 }
 0xf5b   :  { %v1888_v12 = vadd.f32 %v842_v14, %v834_v13 }
 0xf5c   :  { %v859_v18 = vpop.permute.xlu1 %858 }
 0xf5d   :  { %1519 = vtanh.f32 %v1888_v12  ;;  %v1892_v15 = vadd.f32 %v859_v18, %v851_v17 }
 0xf5f   :  { %1521 = vtanh.f32 %v1892_v15 }
 0xf6a   :  { %v1520_v19 = vpop.eup %1519 }
 0xf6b   :  { %847 = vrot.lane.b32.xlu0 %v1520_v19, %s1612_s1 }
 0xf6c   :  { %v1522_v20 = vpop.eup %1521 }
 0xf6d   :  { %864 = vrot.lane.b32.xlu1 %v1522_v20, %s1612_s1 }
 0xfdd   :  { %v848_v21 = vpop.permute.xlu0 %847 }
 0xfde   :  { %v850_v22 = vmul.f32 %v1516_v6, %v848_v21  ;;  %v1021_v6 = vrot.slane %v1017_v2, 6 }
 0xfdf   :  { %v865_v23 = vpop.permute.xlu1 %864 }
 0xfe0   :  { %869 = vrot.lane.b32.xlu0 %v850_v22, %s1614_s19  ;;  %v867_v24 = vmul.f32 %v1518_v9, %v865_v23 }
 0xfe2   :  { %873 = vrot.lane.b32.xlu1 %v867_v24, %s1612_s1 }
0x1052   :  { %v870_v25 = vpop.permute.xlu0 %869 }
0x1054   :  { %v874_v26 = vpop.permute.xlu1 %873 }
0x1055   :  { %v876_v27 = vsel %vm181_vm2, %v870_v25, %v874_v26 }
0x1056   :  { %1370 = vmatmul.mubr.msk.f32.vlgmr.msra.gmra.mxu0 %vm191_vm3, %v876_v27 }
0x1057   :  { %1394 = vmatpush3.msra.mxu0 %v1650_v29  ;;  %v877_v29 = vld [vmem:[#allocation2 + $0x18] sm:$0x30]  ;;  %1409 = vmatprep.mubr.msk.f32.mxu0 %vm1615_vm5, %v1611_v1 }
0x1058   :  { %1395 = vmatprep.subr.mxu0 %v1611_v1 }
0x1059   :  { %1396 = vmatpush3.msra.mxu0 %v1654_v31  ;;  %v878_v31 = vld [vmem:[#allocation2 + $0x8] sm:$0x30] }
0x105a   :  { %1397 = vmatprep.subr.mxu0 %v1611_v1  ;;  %v882_v16 = vrot.slane %v878_v31, 4 }
0x105b   :  { %1398 = vmatpush3.msra.mxu0 %v1661_v33  ;;  %v881_v33 = vrot.slane %v877_v29, 4 }
0x105c   :  { %1399 = vmatprep.subr.mxu0 %v1611_v1 }
0x105d   :  { %1400 = vmatpush3.msra.mxu0 %v1669_v35 }
0x105e   :  { %1401 = vmatprep.subr.mxu0 %v1611_v1 }
0x105f   :  { %1402 = vmatpush3.msra.mxu0 %v1677_v37 }
0x1060   :  { %1403 = vmatprep.subr.mxu0 %v1611_v1 }
0x1061   :  { %1404 = vmatpush3.msra.mxu0 %v1685_v39 }
0x1062   :  { %1405 = vmatprep.subr.mxu0 %v1611_v1 }
0x1063   :  { %1406 = vmatpush3.msra.mxu0 %v1693_v42 }
0x1064   :  { %1407 = vmatprep.subr.mxu0 %v1611_v1 }
0x1065   :  { %1408 = vmatpush3.msra.mxu0 %v1700_v44 }
0x1116   :  { %v954_v35 = vpop.f32.mrf.mxu0 }
0x1117   :  { %v955_v28 = vadd.f32 %v954_v35, %v881_v33 }
0x1118   :  { %v956_v41 = vpop.f32.mrf.mxu0 }
0x1119   :  { %1523 = vtanh.f32 %v955_v28  ;;  %v957_v37 = vadd.f32 %v956_v41, %v882_v16  ;;  %v1371_v42 = vmul.f32 -1.442695, %v955_v28 }
0x111b   :  { %1525 = vtanh.f32 %v957_v37  ;;  %v1372_v47 = vmul.f32 -1.442695, %v957_v37 }
0x111c   :  { %1527 = vpow2.f32 %v1371_v42 }
0x111d   :  { %1529 = vpow2.f32 %v1372_v47  ;;  %v1155_v47 = vld [vmem:[#allocation2] sm:$0x3] }
0x1126   :  { %v1524_v46 = vpop.eup %1523 }
0x1127   :  { %975 = vrot.lane.b32.xlu0 %v1524_v46, %s1612_s1 }
0x1128   :  { %v1526_v39 = vpop.eup %1525 }
0x1129   :  { %992 = vrot.lane.b32.xlu1 %v1526_v39, %s1612_s1  ;;  %v1528_v44 = vpop.eup %1527 }
0x112a   :  { %v1530_v48 = vpop.eup %1529  ;;  %v965_v49 = vadd.f32 1.0, %v1528_v44 }
0x112b   :  { %v966_v50 = vadd.f32 1.0, %v1530_v48 }
0x112c   :  { %1531 = vrcp.f32 %v965_v49 }
0x112d   :  { %1533 = vrcp.f32 %v966_v50 }
0x1139   :  { %v1532_v51 = vpop.eup %1531 }
0x113a   :  { %v1534_v54 = vpop.eup %1533  ;;  %v973_v57 = vmul.f32 %v1532_v51, %v1888_v12 }
0x113b   :  { %v990_v60 = vmul.f32 %v1534_v54, %v1892_v15 }
0x1199   :  { %v976_v52 = vpop.permute.xlu0 %975 }
0x119a   :  { %v978_v53 = vmul.f32 %v1532_v51, %v976_v52 }
0x119b   :  { %v993_v55 = vpop.permute.xlu1 %992 }
0x119c   :  { %980 = vrot.lane.b32.xlu0 %v978_v53, %s1614_s19  ;;  %v995_v56 = vmul.f32 %v1534_v54, %v993_v55 }
0x119e   :  { %997 = vrot.lane.b32.xlu1 %v995_v56, %s1614_s19 }
0x120e   :  { %v981_v58 = vpop.permute.xlu0 %980 }
0x120f   :  { %v983_v59 = vadd.f32 %v981_v58, %v973_v57 }
0x1210   :  { %v998_v30 = vpop.permute.xlu1 %997 }
0x1211   :  { %1535 = vtanh.f32 %v983_v59  ;;  %v1000_v32 = vadd.f32 %v998_v30, %v990_v60  ;;  %v1256_v60 = vld [vmem:[#allocation3 + $0x110] sm:$0xff]  ;;  %v1255_v30 = vld [vmem:[#allocation3 + $0x100] sm:$0xff] }
0x1213   :  { %1537 = vtanh.f32 %v1000_v32 }
0x121e   :  { %v1536_v34 = vpop.eup %1535 }
0x121f   :  { %986 = vrot.lane.b32.xlu0 %v1536_v34, %s1612_s1  ;;  %v1253_v34 = vld [vmem:[#allocation3 + $0xe0] sm:$0xff] }
0x1220   :  { %v1538_v36 = vpop.eup %1537 }
0x1221   :  { %1003 = vrot.lane.b32.xlu1 %v1538_v36, %s1612_s1 }
0x1291   :  { %v987_v61 = vpop.permute.xlu0 %986 }
0x1292   :  { %v989_v38 = vmul.f32 %v1532_v51, %v987_v61 }
0x1293   :  { %v1004_v62 = vpop.permute.xlu1 %1003 }
0x1294   :  { %1008 = vrot.lane.b32.xlu0 %v989_v38, %s1614_s19  ;;  %v1006_v63 = vmul.f32 %v1534_v54, %v1004_v62 }
0x1296   :  { %1012 = vrot.lane.b32.xlu1 %v1006_v63, %s1612_s1  ;;  %v1257_v63 = vld [vmem:[#allocation3 + $0x120] ss:$0 sm:$0xff] }
0x1306   :  { %v1009_v40 = vpop.permute.xlu0 %1008 }
0x1308   :  { %v1013_v43 = vpop.permute.xlu1 %1012 }
0x1309   :  { %v1015_v0 = vsel %vm181_vm2, %v1009_v40, %v1013_v43 }
0x130a   :  { %1373 = vmatmul.mubr.msk.f32.vlgmr.msra.gmra.mxu1 %vm191_vm3, %v1015_v0 }
0x130b   :  { %1420 = vmatprep.mubr.msk.f32.mxu1 %vm1615_vm5, %v1611_v1  ;;  %1413 = vmatpush3.msra.mxu1 %v1256_v60 }
0x130c   :  { %1414 = vmatprep.subr.mxu1 %v1611_v1 }
0x130d   :  { %1415 = vmatpush3.msra.mxu1 %v1255_v30 }
0x130e   :  { %1416 = vmatprep.subr.mxu1 %v1611_v1 }
0x13ca   :  { %v1093_v4 = vpop.f32.mrf.mxu1 }
0x13cb   :  { %v1094_v5 = vadd.f32 %v1093_v4, %v1020_v3 }
0x13cc   :  { %v1095_v7 = vpop.f32.mrf.mxu1 }
0x13cd   :  { %1539 = vtanh.f32 %v1094_v5  ;;  %v1096_v8 = vadd.f32 %v1095_v7, %v1021_v6  ;;  %v1374_v11 = vmul.f32 -1.442695, %v1094_v5 }
0x13cf   :  { %1541 = vtanh.f32 %v1096_v8  ;;  %v1375_v13 = vmul.f32 -1.442695, %v1096_v8 }
0x13d0   :  { %1543 = vpow2.f32 %v1374_v11 }
0x13d1   :  { %1545 = vpow2.f32 %v1375_v13 }
0x13da   :  { %v1540_v9 = vpop.eup %1539 }
0x13db   :  { %1114 = vrot.lane.b32.xlu0 %v1540_v9, %s1612_s1 }
0x13dc   :  { %v1542_v10 = vpop.eup %1541 }
0x13dd   :  { %1131 = vrot.lane.b32.xlu1 %v1542_v10, %s1612_s1  ;;  %v1544_v14 = vpop.eup %1543 }
0x13de   :  { %v1546_v12 = vpop.eup %1545  ;;  %v1104_v17 = vadd.f32 1.0, %v1544_v14 }
0x13df   :  { %v1105_v18 = vadd.f32 1.0, %v1546_v12 }
0x13e0   :  { %1547 = vrcp.f32 %v1104_v17 }
0x13e1   :  { %1549 = vrcp.f32 %v1105_v18 }
0x13ed   :  { %v1548_v15 = vpop.eup %1547 }
0x13ee   :  { %v1550_v21 = vpop.eup %1549  ;;  %v1112_v24 = vmul.f32 %v1548_v15, %v983_v59 }
0x13ef   :  { %v1129_v27 = vmul.f32 %v1550_v21, %v1000_v32  ;;  %v1254_v32 = vld [vmem:[#allocation3 + $0xf0] sm:$0xff] }
0x13f0   :  { %1417 = vmatpush3.msra.mxu1 %v1254_v32 }
0x13f1   :  { %1418 = vmatprep.subr.mxu1 %v1611_v1 }
0x13f2   :  { %1419 = vmatpush3.msra.mxu1 %v1253_v34 }
0x144d   :  { %v1115_v19 = vpop.permute.xlu0 %1114 }
0x144e   :  { %v1117_v20 = vmul.f32 %v1548_v15, %v1115_v19 }
0x144f   :  { %v1132_v22 = vpop.permute.xlu1 %1131 }
0x1450   :  { %1119 = vrot.lane.b32.xlu0 %v1117_v20, %s1614_s19  ;;  %v1134_v23 = vmul.f32 %v1550_v21, %v1132_v22 }
0x1452   :  { %1136 = vrot.lane.b32.xlu1 %v1134_v23, %s1614_s19 }
0x14c2   :  { %v1120_v25 = vpop.permute.xlu0 %1119 }
0x14c3   :  { %v1122_v26 = vadd.f32 %v1120_v25, %v1112_v24 }
0x14c4   :  { %v1137_v29 = vpop.permute.xlu1 %1136 }
0x14c5   :  { %1551 = vtanh.f32 %v1122_v26  ;;  %v1139_v31 = vadd.f32 %v1137_v29, %v1129_v27 }
0x14c7   :  { %1553 = vtanh.f32 %v1139_v31 }
0x14d2   :  { %v1552_v33 = vpop.eup %1551 }
0x14d3   :  { %1125 = vrot.lane.b32.xlu0 %v1552_v33, %s1612_s1 }
0x14d4   :  { %v1554_v35 = vpop.eup %1553 }
0x14d5   :  { %1142 = vrot.lane.b32.xlu1 %v1554_v35, %s1612_s1 }
0x1545   :  { %v1126_v28 = vpop.permute.xlu0 %1125 }
0x1546   :  { %v1128_v16 = vmul.f32 %v1548_v15, %v1126_v28 }
0x1547   :  { %v1143_v41 = vpop.permute.xlu1 %1142 }
0x1548   :  { %1147 = vrot.lane.b32.xlu0 %v1128_v16, %s1614_s19  ;;  %v1145_v37 = vmul.f32 %v1550_v21, %v1143_v41 }
0x154a   :  { %1151 = vrot.lane.b32.xlu1 %v1145_v37, %s1612_s1 }
0x15ba   :  { %v1148_v46 = vpop.permute.xlu0 %1147 }
0x15bc   :  { %v1152_v39 = vpop.permute.xlu1 %1151 }
0x15bd   :  { %v1154_v42 = vsel %vm181_vm2, %v1148_v46, %v1152_v39 }
0x15be   :  { %1410 = vmatmul.mubr.msk.f32.vlgmr.msra.gmra.mxu0 %vm191_vm3, %v1154_v42 }
0x167e   :  { %v1225_v44 = vpop.f32.mrf.mxu0 }
0x167f   :  { %v1226_v48 = vadd.f32 %v1225_v44, %v1155_v47 }
0x1680   :  { %v1411_v49 = vpop.f32.mrf.mxu0 }
0x1681   :  { %1555 = vtanh.f32 %v1226_v48  ;;  %v1377_v51 = vmul.f32 -1.442695, %v1226_v48 }
0x1683   :  { %1557 = vpow2.f32 %v1377_v51 }
0x168e   :  { %v1556_v50 = vpop.eup %1555 }
0x168f   :  { %1238 = vrot.lane.b32.xlu0 %v1556_v50, %s1612_s1 }
0x1690   :  { %v1558_v52 = vpop.eup %1557 }
0x1691   :  { %v1232_v53 = vadd.f32 1.0, %v1558_v52 }
0x1693   :  { %1559 = vrcp.f32 %v1232_v53 }
0x16a0   :  { %v1560_v54 = vpop.eup %1559 }
0x16a1   :  { %v1236_v57 = vmul.f32 %v1560_v54, %v1139_v31 }
0x1701   :  { %v1239_v55 = vpop.permute.xlu0 %1238 }
0x1702   :  { %v1241_v56 = vmul.f32 %v1560_v54, %v1239_v55 }
0x1704   :  { %1243 = vrot.lane.b32.xlu1 %v1241_v56, %s1614_s19 }
0x1776   :  { %v1244_v58 = vpop.permute.xlu1 %1243 }
0x1777   :  { %v1246_v59 = vadd.f32 %v1244_v58, %v1236_v57 }
0x1779   :  { %1561 = vtanh.f32 %v1246_v59 }
0x1786   :  { %v1562_v36 = vpop.eup %1561 }
0x1787   :  { %1249 = vrot.lane.b32.xlu0 %v1562_v36, %s1612_s1 }
0x17f9   :  { %v1250_v61 = vpop.permute.xlu0 %1249 }
0x17fa   :  { %v1252_v38 = vmul.f32 %v1560_v54, %v1250_v61 }
0x17fc   :  { %1259 = vrot.lane.b32.xlu1 %v1252_v38, %s1614_s19 }
0x186e   :  { %v1260_v62 = vpop.permute.xlu1 %1259 }
0x186f   :  { %1421 = vmatmul.mubr.msk.f32.vlgmr.msra.gmra.mxu1 %vm181_vm2, %v1260_v62 }
0x192f   :  { %v1329_v40 = vpop.f32.mrf.mxu1 }
0x1930   :  { %v1330_v43 = vadd.f32 %v1329_v40, %v1257_v63 }
0x1931   :  { %v1422_v0 = vpop.f32.mrf.mxu1 }
0x1932   :  { %1334 = vst.msk [vmem:[#allocation6] sm:$0x3] %vm1333_vm6, %v1330_v43 }
0x1933   :  { %1594 = shalt.err (!%p1591_p9)
}
0x1934   :  { %1344 = dma.vmem_to_hbm [thread:$0]  %s1342_s22, 32, %s1953_s2, [#allocation5]  }
0x1935   :  { %1605 = dma.done.wait [#allocation5], 32  }
0x1936   :  { %1606 = vsyncadd [#allocation5], 4294967264 }
0x1937   :  { %1348 = vsyncpa [#allocation4], 1 }
0x1938   :  { %1349 = vsyncpa [#allocation5], 1 }

</bundles_post_ra>
